<compile_context>
chip_gen: v6e
topology: v6e:2x2x1
jax: 0.10.0
libtpu: 0.0.40
codegen_flags: <defaults>
</compile_context>

<pallas_src>
import functools

import jax
import jax.numpy as jnp
import numpy as np
from jax.experimental import pallas as pl
from jax.experimental.pallas import tpu as pltpu

# Standard constants of the hard-concrete / L0 formulation (Louizos et al.).
LIMIT_A = -0.1
LIMIT_B = 1.1
EPSILON = 1e-6
TEMPERATURE = 2.0 / 3.0


# ----------------------------------------------------------------------------
# Stage 1: batch-invariant masked adaptive adjacency + Chebyshev stack
# ----------------------------------------------------------------------------
def _graph_kernel(ne_ref, eps_ref, qz_ref, t_ref, *, cheb_k, temperature,
                  limit_a, limit_b):
    """t_ref <- stacked T_1 .. T_{cheb_k-1}  (T_0 = I is handled implicitly)."""
    ne = ne_ref[...]                                          # (N, D)
    n = ne.shape[0]

    # supports = softmax(relu(ne @ ne.T), dim=1)  (row softmax -> lane-axis reduce)
    s = jax.lax.dot_general(ne, ne, (((1,), (1,)), ((), ())),
                            preferred_element_type=jnp.float32)
    s = jnp.maximum(s, 0.0)
    e = jnp.exp(s - jnp.max(s, axis=-1, keepdims=True))
    soft = e / jnp.sum(e, axis=-1, keepdims=True)

    # hard-concrete gate: mask = hardtanh(quantile_concrete(eps), 0, 1)
    eps = eps_ref[...]
    z = jax.nn.sigmoid((jnp.log(eps) - jnp.log(1.0 - eps) + qz_ref[...])
                       / temperature)
    z = z * (limit_b - limit_a) + limit_a
    mask = jnp.clip(z, 0.0, 1.0)

    supports = mask * soft                                    # (N, N), f32
    t_ref[0] = supports.astype(t_ref.dtype)                   # T_1

    if cheb_k > 2:
        # identity only needed for the recursion's "- T_{k-2}" term
        row = jax.lax.broadcasted_iota(jnp.int32, (n, n), 0)
        col = jax.lax.broadcasted_iota(jnp.int32, (n, n), 1)
        t_prev2 = (row == col).astype(jnp.float32)            # T_0 = I
        t_prev1 = supports
        sup_bf = supports.astype(jnp.bfloat16)
        for k in range(2, cheb_k):
            # bf16 MXU inputs, f32 accumulation / subtraction
            t_new = 2.0 * jnp.dot(sup_bf, t_prev1.astype(jnp.bfloat16),
                                  preferred_element_type=jnp.float32) - t_prev2
            t_ref[k - 1] = t_new.astype(t_ref.dtype)          # store as produced
            t_prev2, t_prev1 = t_prev1, t_new


# ----------------------------------------------------------------------------
# Stage 2: batched graph propagation + per-node weighted contraction
# ----------------------------------------------------------------------------
def _gconv_kernel(xt_ref, t_ref, w_ref, b_ref, out_ref, *, cheb_k, dim_in,
                  block_b):
    """One batch block.

    xt_ref : (1, N, block_b*dim_in)   x for this block, column = b*dim_in + i
    t_ref  : (cheb_k-1, N, N)         Chebyshev supports T_1..T_{K-1} (bf16)
    w_ref  : (cheb_k*dim_in, N, dim_out)  per-node weights, plane j = k*dim_in+i
    b_ref  : (N, dim_out)             per-node bias
    out_ref: (block_b, N, dim_out)
    """
    x_blk = xt_ref[0]                                         # (N, block_b*dim_in)
    x_bf = x_blk.astype(jnp.bfloat16)

    # y[k] = T_k @ x for the whole block; T_0 = I -> y[0] = x (no matmul).
    y = [x_blk]
    for k in range(1, cheb_k):
        y.append(jnp.dot(t_ref[k - 1], x_bf,
                         preferred_element_type=jnp.float32))

    bias = b_ref[...]                                         # (N, dim_out)
    w = [w_ref[j] for j in range(cheb_k * dim_in)]            # (N, dim_out) planes

    for b in range(block_b):
        acc = bias
        for k in range(cheb_k):
            yk = y[k]
            for i in range(dim_in):
                c = b * dim_in + i
                acc = acc + yk[:, c:c + 1] * w[k * dim_in + i]
        out_ref[b] = acc.astype(out_ref.dtype)                # early per-b writeback


# ----------------------------------------------------------------------------
# Wrapper
# ----------------------------------------------------------------------------
def l0awvgcn_forward(x, node_embeddings, weights_pool, bias_pool, qz_loga, eps,
                     *, temperature=TEMPERATURE, block_b=8):
    """x: (B, N, dim_in); node_embeddings: (N, D); eps: uniform(EPSILON,1-EPSILON) (N,N)."""
    B, N, dim_in = x.shape
    D = node_embeddings.shape[1]
    _, cheb_k, _, dim_out = weights_pool.shape
    assert cheb_k >= 2

    # Parameter-only preprocessing (independent of x): per-node weights laid out
    # as (cheb_k*dim_in, N, dim_out) so the kernel grabs one lane-aligned plane
    # per (k, i) term -> no in-kernel concat / (N, K*I, O) temp.
    w_kino = jnp.einsum('nd,dkio->kino', node_embeddings,
                        weights_pool).reshape(cheb_k * dim_in, N, dim_out)
    bias = node_embeddings @ bias_pool                        # (N, dim_out)

    # ---- stage 1: batch-invariant adjacency + Chebyshev stack (runs once) ----
    t_stack = pl.pallas_call(
        functools.partial(_graph_kernel, cheb_k=cheb_k, temperature=temperature,
                          limit_a=LIMIT_A, limit_b=LIMIT_B),
        out_shape=jax.ShapeDtypeStruct((cheb_k - 1, N, N), jnp.bfloat16),
        grid=(1,),
        in_specs=[
            pl.BlockSpec((N, D), lambda i: (0, 0)),
            pl.BlockSpec((N, N), lambda i: (0, 0)),
            pl.BlockSpec((N, N), lambda i: (0, 0)),
        ],
        out_specs=pl.BlockSpec((cheb_k - 1, N, N), lambda i: (0, 0, 0)),
        compiler_params=pltpu.CompilerParams(
            dimension_semantics=("arbitrary",)),
    )(node_embeddings, eps, qz_loga)

    # ---- stage 2: batch-blocked propagation + contraction --------------------
    # Block several batch elements per grid step (amortize per-step overhead),
    # but keep >= 2 grid steps so both v7x TensorCores get work.
    block_b = max(1, min(block_b, B))
    if B >= 2 and pl.cdiv(B, block_b) < 2:
        block_b = pl.cdiv(B, 2)
    nb = pl.cdiv(B, block_b)
    b_pad = nb * block_b
    xp = x if b_pad == B else jnp.pad(x, ((0, b_pad - B), (0, 0), (0, 0)))

    # Lay x out as (nb, N, block_b*dim_in): one MXU matmul per Chebyshev order
    # propagates the whole block (one-time layout plumbing in XLA).
    x_t = jnp.transpose(xp.reshape(nb, block_b, N, dim_in),
                        (0, 2, 1, 3)).reshape(nb, N, block_b * dim_in)

    out = pl.pallas_call(
        functools.partial(_gconv_kernel, cheb_k=cheb_k, dim_in=dim_in,
                          block_b=block_b),
        out_shape=jax.ShapeDtypeStruct((b_pad, N, dim_out), jnp.float32),
        grid=(nb,),
        in_specs=[
            pl.BlockSpec((1, N, block_b * dim_in), lambda b: (b, 0, 0)),
            pl.BlockSpec((cheb_k - 1, N, N), lambda b: (0, 0, 0)),
            pl.BlockSpec((cheb_k * dim_in, N, dim_out), lambda b: (0, 0, 0)),
            pl.BlockSpec((N, dim_out), lambda b: (0, 0)),
        ],
        out_specs=pl.BlockSpec((block_b, N, dim_out), lambda b: (b, 0, 0)),
        compiler_params=pltpu.CompilerParams(
            dimension_semantics=("parallel",)),
    )(x_t, t_stack, w_kino, bias)

    return out[:B]


# ----------------------------------------------------------------------------
# Pure-JAX reference replicating the PyTorch forward exactly (f32)
# ----------------------------------------------------------------------------
def ref_forward(x, node_embeddings, weights_pool, bias_pool, qz_loga, eps,
                temperature=TEMPERATURE):
    B, N, _ = x.shape
    cheb_k = weights_pool.shape[1]
    weights = jnp.einsum('nd,dkio->nkio', node_embeddings, weights_pool)
    bias = node_embeddings @ bias_pool
    supports = jax.nn.softmax(
        jax.nn.relu(node_embeddings @ node_embeddings.T), axis=1)
    # sample_weights() with the same eps
    z = jax.nn.sigmoid((jnp.log(eps) - jnp.log(1.0 - eps) + qz_loga) / temperature)
    z = z * (LIMIT_B - LIMIT_A) + LIMIT_A
    mask = jnp.clip(z, 0.0, 1.0)
    supports = mask * supports
    support_set = [jnp.eye(N, dtype=jnp.float32), supports]
    for _ in range(2, cheb_k):
        support_set.append(2.0 * (supports @ support_set[-1]) - support_set[-2])
    supports_k = jnp.stack(support_set, axis=0)               # (K, N, N)
    x_g = jnp.einsum('knm,bmi->bkni', supports_k, x)
    x_g = jnp.transpose(x_g, (0, 2, 1, 3))                    # (B, N, K, I)
    x_gconv = jnp.einsum('bnki,nkio->bno', x_g, weights) + bias
    return x_gconv


if __name__ == "__main__":
    # Small, module-consistent shapes (AGCRN/PEMS08 uses N=170 nodes).
    B, N, dim_in, dim_out, cheb_k, embed_dim = 8, 170, 4, 8, 3, 8

    key = jax.random.PRNGKey(0)
    k1, k2, k3, k4, k5, k6 = jax.random.split(key, 6)

    x = jax.random.normal(k1, (B, N, dim_in), dtype=jnp.float32)
    node_embeddings = jax.random.normal(k2, (N, embed_dim), dtype=jnp.float32) * 0.3
    weights_pool = jax.random.normal(
        k3, (embed_dim, cheb_k, dim_in, dim_out), dtype=jnp.float32) * 0.1
    bias_pool = jax.random.normal(k4, (embed_dim, dim_out), dtype=jnp.float32) * 0.1
    # qz_loga init: normal(log(1-droprate)-log(droprate), 0.01) = normal(0, 0.01)
    qz_loga = jax.random.normal(k5, (N, N), dtype=jnp.float32) * 0.01
    # uniform eps of get_eps() (torch .uniform_) drawn host-side for determinism
    eps = jax.random.uniform(k6, (N, N), dtype=jnp.float32,
                             minval=EPSILON, maxval=1.0 - EPSILON)

    x_gconv = l0awvgcn_forward(
        x, node_embeddings, weights_pool, bias_pool, qz_loga, eps)
    jax.block_until_ready(x_gconv)

    ref = ref_forward(x, node_embeddings, weights_pool, bias_pool, qz_loga, eps)

    np.testing.assert_allclose(np.asarray(x_gconv), np.asarray(ref),
                               rtol=1e-2, atol=1e-2)

    print("KERNEL_OK")
</pallas_src>

<mosaic_0001>
module attributes {stable_mosaic.version = 11 : i64} {
  func.func @_graph_kernel(%arg0: i32, %arg1: memref<170x8xf32, #tpu.memory_space<vmem>>, %arg2: memref<170x170xf32, #tpu.memory_space<vmem>>, %arg3: memref<170x170xf32, #tpu.memory_space<vmem>>, %arg4: memref<2x170x170xbf16, #tpu.memory_space<vmem>>) attributes {dimension_semantics = [#tpu.dimension_semantics<arbitrary>], iteration_bounds = array<i64: 1>, scalar_prefetch = 0 : i64, scratch_operands = 0 : i64, tpu.core_type = #tpu.core_type<tc>, window_params = [{pipeline_mode = #tpu.pipeline_mode<synchronous>, transform_indices = @transform_0, window_bounds = array<i64: 170, 8>}, {pipeline_mode = #tpu.pipeline_mode<synchronous>, transform_indices = @transform_1, window_bounds = array<i64: 170, 170>}, {pipeline_mode = #tpu.pipeline_mode<synchronous>, transform_indices = @transform_2, window_bounds = array<i64: 170, 170>}, {pipeline_mode = #tpu.pipeline_mode<synchronous>, transform_indices = @transform_3, window_bounds = array<i64: 2, 170, 170>}]} {
    %c0 = arith.constant 0 : index
    %c0_0 = arith.constant 0 : index
    %0 = vector.load %arg1[%c0, %c0_0] : memref<170x8xf32, #tpu.memory_space<vmem>>, vector<170x8xf32>
    %cst = arith.constant dense<0.000000e+00> : vector<170x170xf32>
    %1 = tpu.matmul %0, %0, %cst {dimension_numbers = #tpu.dot_dimension_numbers<[1], [1], [0], [0], [0, 0, 1, 0], [], []>} : vector<170x8xf32>, vector<170x8xf32>, vector<170x170xf32> -> vector<170x170xf32>
    %cst_1 = arith.constant 0.000000e+00 : f32
    %2 = vector.broadcast %cst_1 : f32 to vector<170x170xf32>
    %3 = arith.maximumf %1, %2 : vector<170x170xf32>
    %cst_2 = arith.constant dense<0xFF800000> : vector<170xf32>
    %4 = vector.multi_reduction <maximumf>, %3, %cst_2 [1] : vector<170x170xf32> to vector<170xf32>
    %5 = vector.shape_cast %4 : vector<170xf32> to vector<170x1xf32>
    %6 = vector.broadcast %5 : vector<170x1xf32> to vector<170x170xf32>
    %7 = arith.subf %3, %6 : vector<170x170xf32>
    %8 = math.exp %7 : vector<170x170xf32>
    %cst_3 = arith.constant dense<0.000000e+00> : vector<170xf32>
    %9 = vector.multi_reduction <add>, %8, %cst_3 [1] : vector<170x170xf32> to vector<170xf32>
    %10 = vector.shape_cast %9 : vector<170xf32> to vector<170x1xf32>
    %11 = vector.broadcast %10 : vector<170x1xf32> to vector<170x170xf32>
    %12 = arith.divf %8, %11 : vector<170x170xf32>
    %c0_4 = arith.constant 0 : index
    %c0_5 = arith.constant 0 : index
    %13 = vector.load %arg2[%c0_4, %c0_5] : memref<170x170xf32, #tpu.memory_space<vmem>>, vector<170x170xf32>
    %14 = math.log %13 : vector<170x170xf32>
    %cst_6 = arith.constant 1.000000e+00 : f32
    %15 = vector.broadcast %cst_6 : f32 to vector<170x170xf32>
    %16 = arith.subf %15, %13 : vector<170x170xf32>
    %17 = math.log %16 : vector<170x170xf32>
    %18 = arith.subf %14, %17 : vector<170x170xf32>
    %c0_7 = arith.constant 0 : index
    %c0_8 = arith.constant 0 : index
    %19 = vector.load %arg3[%c0_7, %c0_8] : memref<170x170xf32, #tpu.memory_space<vmem>>, vector<170x170xf32>
    %20 = arith.addf %18, %19 : vector<170x170xf32>
    %cst_9 = arith.constant 0.666666686 : f32
    %21 = vector.broadcast %cst_9 : f32 to vector<170x170xf32>
    %22 = arith.divf %20, %21 : vector<170x170xf32>
    %23 = arith.negf %22 : vector<170x170xf32>
    %24 = math.exp %23 : vector<170x170xf32>
    %cst_10 = arith.constant 1.000000e+00 : f32
    %25 = vector.broadcast %cst_10 : f32 to vector<170x170xf32>
    %26 = arith.addf %25, %24 : vector<170x170xf32>
    %27 = arith.divf %25, %26 : vector<170x170xf32>
    %cst_11 = arith.constant 1.200000e+00 : f32
    %28 = vector.broadcast %cst_11 : f32 to vector<170x170xf32>
    %29 = arith.mulf %27, %28 : vector<170x170xf32>
    %cst_12 = arith.constant -1.000000e-01 : f32
    %30 = vector.broadcast %cst_12 : f32 to vector<170x170xf32>
    %31 = arith.addf %29, %30 : vector<170x170xf32>
    %cst_13 = arith.constant 0.000000e+00 : f32
    %cst_14 = arith.constant 1.000000e+00 : f32
    %32 = vector.broadcast %cst_13 : f32 to vector<170x170xf32>
    %33 = arith.maximumf %32, %31 : vector<170x170xf32>
    %34 = vector.broadcast %cst_14 : f32 to vector<170x170xf32>
    %35 = arith.minimumf %34, %33 : vector<170x170xf32>
    %36 = arith.mulf %35, %12 : vector<170x170xf32>
    %37 = arith.truncf %36 : vector<170x170xf32> to vector<170x170xbf16>
    %c0_15 = arith.constant 0 : index
    %c0_16 = arith.constant 0 : index
    %c0_17 = arith.constant 0 : index
    %38 = vector.load %arg4[%c0_15, %c0_16, %c0_17] : memref<2x170x170xbf16, #tpu.memory_space<vmem>>, vector<1x170x170xbf16>
    %39 = vector.shape_cast %38 : vector<1x170x170xbf16> to vector<170x170xbf16>
    %40 = vector.shape_cast %37 : vector<170x170xbf16> to vector<1x170x170xbf16>
    tpu.vector_store %arg4[%c0_15, %c0_16, %c0_17], %40 {strides = array<i32>} : memref<2x170x170xbf16, #tpu.memory_space<vmem>>, vector<1x170x170xbf16>,
    %41 = tpu.iota {dimensions = array<i32: 0>} : vector<170x170xi32>
    %42 = tpu.iota {dimensions = array<i32: 1>} : vector<170x170xi32>
    %43 = arith.cmpi eq, %41, %42 : vector<170x170xi32>
    %44 = arith.extui %43 : vector<170x170xi1> to vector<170x170xi32>
    %45 = arith.sitofp %44 : vector<170x170xi32> to vector<170x170xf32>
    %46 = arith.truncf %36 : vector<170x170xf32> to vector<170x170xbf16>
    %47 = arith.truncf %36 : vector<170x170xf32> to vector<170x170xbf16>
    %cst_18 = arith.constant dense<0.000000e+00> : vector<170x170xf32>
    %48 = tpu.matmul %46, %47, %cst_18 {dimension_numbers = #tpu.dot_dimension_numbers<[1], [0], [0], [1], [0, 0, 1, 1], [], []>} : vector<170x170xbf16>, vector<170x170xbf16>, vector<170x170xf32> -> vector<170x170xf32>
    %cst_19 = arith.constant 2.000000e+00 : f32
    %49 = vector.broadcast %cst_19 : f32 to vector<170x170xf32>
    %50 = arith.mulf %49, %48 : vector<170x170xf32>
    %51 = arith.subf %50, %45 : vector<170x170xf32>
    %52 = arith.truncf %51 : vector<170x170xf32> to vector<170x170xbf16>
    %c1 = arith.constant 1 : index
    %c0_20 = arith.constant 0 : index
    %c0_21 = arith.constant 0 : index
    %53 = vector.load %arg4[%c1, %c0_20, %c0_21] : memref<2x170x170xbf16, #tpu.memory_space<vmem>>, vector<1x170x170xbf16>
    %54 = vector.shape_cast %53 : vector<1x170x170xbf16> to vector<170x170xbf16>
    %55 = vector.shape_cast %52 : vector<170x170xbf16> to vector<1x170x170xbf16>
    tpu.vector_store %arg4[%c1, %c0_20, %c0_21], %55 {strides = array<i32>} : memref<2x170x170xbf16, #tpu.memory_space<vmem>>, vector<1x170x170xbf16>,
    return
  }
  func.func @transform_0(%arg0: i32) -> (i32, i32) {
    %c0_i32 = arith.constant 0 : i32
    %c0_i32_0 = arith.constant 0 : i32
    %c0_i32_1 = arith.constant 0 : i32
    return %c0_i32, %c0_i32_0 : i32, i32
  }
  func.func @transform_1(%arg0: i32) -> (i32, i32) {
    %c0_i32 = arith.constant 0 : i32
    %c0_i32_0 = arith.constant 0 : i32
    %c0_i32_1 = arith.constant 0 : i32
    return %c0_i32, %c0_i32_0 : i32, i32
  }
  func.func @transform_2(%arg0: i32) -> (i32, i32) {
    %c0_i32 = arith.constant 0 : i32
    %c0_i32_0 = arith.constant 0 : i32
    %c0_i32_1 = arith.constant 0 : i32
    return %c0_i32, %c0_i32_0 : i32, i32
  }
  func.func @transform_3(%arg0: i32) -> (i32, i32, i32) {
    %c0_i32 = arith.constant 0 : i32
    %c0_i32_0 = arith.constant 0 : i32
    %c0_i32_1 = arith.constant 0 : i32
    %c0_i32_2 = arith.constant 0 : i32
    return %c0_i32, %c0_i32_0, %c0_i32_1 : i32, i32, i32
  }
}

</mosaic_0001>

<bundles_post_ra>
// kernel: tpu_custom_call.1
= control target key start
LH: loop header
LB: loop body
LE: loop exit
PB: predicated region body
PF: predicated region fallthrough
CT: control target
= control target key end

     0   :  { %8 = vsyncpa [#allocation3], 0  ;;  %s4624_s0 = inlined_call_operand.vmem [shape: f32[170,8], index: 0, kind: input, shape index: {}]   ;;  %s4625_s1 = inlined_call_operand.hbm [shape: f32[170,170], index: 1, kind: input, shape index: {}]   ;;  %s4626_s2 = inlined_call_operand.hbm [shape: f32[170,170], index: 2, kind: input, shape index: {}]   ;;  %s4627_s3 = inlined_call_operand.vmem [shape: bf16[2,170,170], index: 3, kind: output, shape index: {}]  }
   0x1   :  { %9 = vsyncpa [#allocation5], 0  ;;  %s3191_s12 = smov [#allocation2]  }
   0x2   :  { %s17_s13 = sshll.u32 %s3191_s12, 4  ;;  %s18_s13 = int_to_ptr.vmem [resolvable:$true] %s17_s13 }
   0x3   :  { %s3155_s14 = scalar_lea.vmem %s18_s13, 5632  ;;  %p3160_p1 = scmp.lt.s32.totalorder %s18_s13, %s18_s13 }
   0x4   :  { %p3156_p0 = scmp.ne.s32.totalorder %s18_s13, %s3155_s14  ;;  %p3161_p2 = scmp.lt.s32.totalorder %s3155_s14, %s3155_s14 }
   0x6   :  { %p3162_p3 = por %p3161_p2, %p3160_p1 }
   0x8   :  { %p3163_p4 = pnand %p3162_p3, %p3156_p0 }
   0xa   :  { %3166 = shalt.err (!%p3163_p4)
}
   0xb   :  { %s3192_s15 = smov 256   ;;  %s3193_s16 = smov 16  }
   0xc   :  { %23 = dma.hbm_to_vmem [thread:$0]  %s4625_s1, 5632, %s18_s13, [#allocation3], %s3192_s15, %s3192_s15, %s3193_s16  }
   0xd   :  { %s3194_s19 = smov [#allocation4]  }
   0xe   :  { %s29_s20 = sshll.u32 %s3194_s19, 4  ;;  %s30_s20 = int_to_ptr.vmem [resolvable:$true] %s29_s20 }
   0xf   :  { %s3175_s21 = scalar_lea.vmem %s30_s20, 5632  ;;  %p3180_p6 = scmp.lt.s32.totalorder %s30_s20, %s30_s20 }
  0x10   :  { %p3176_p5 = scmp.ne.s32.totalorder %s30_s20, %s3175_s21  ;;  %p3181_p7 = scmp.lt.s32.totalorder %s3175_s21, %s3175_s21 }
  0x12   :  { %p3182_p8 = por %p3181_p7, %p3180_p6 }
  0x14   :  { %p3183_p9 = pnand %p3182_p8, %p3176_p5 }
  0x16   :  { %3186 = shalt.err (!%p3183_p9)
}
  0x17   :  { %35 = dma.hbm_to_vmem [thread:$0]  %s4626_s2, 5632, %s30_s20, [#allocation5], %s3192_s15, %s3192_s15, %s3193_s16  }
  0x18   :  { %3187 = dma.done.wait [#allocation3], 5632  }
  0x19   :  { %3188 = vsyncadd [#allocation3], 4294961664 }
  0x1a   :  { %3189 = dma.done.wait [#allocation5], 5632  }
  0x1b   :  { %3190 = vsyncadd [#allocation5], 4294961664  ;;  %v4628_v0 = vmov 0.0   ;;  %vm65_vm0 = vcmask 64512   ;;  %v3227_v1 = vld [vmem:[%s4624_s0 + $0x78] sm:$0xff]  ;;  %v3235_v2 = vld [vmem:[%s4624_s0 + $0x70] sm:$0xff] }
  0x1c   :  { %132 = vmatprep.subr.mxu0 %v4628_v0  ;;  %196 = vmatprep.mubr.f32.mxu0 %v4628_v0  ;;  %v3243_v3 = vld [vmem:[%s4624_s0 + $0x68] sm:$0xff]  ;;  %v3251_v4 = vld [vmem:[%s4624_s0 + $0x60] sm:$0xff]  ;;  %v3259_v5 = vld [vmem:[%s4624_s0 + $0x58] sm:$0xff]  ;;  %vm373_vm1 = vcmask 343040   ;;  %vm458_vm2 = vcmask 1041408   ;;  %vm460_vm3 = vcmask 336896  }
  0x1d   :  { %2426 = vmatpush1.xpose.msk.msra.mxu0 %vm65_vm0, %v3227_v1  ;;  %v3267_v6 = vld [vmem:[%s4624_s0 + $0x50] sm:$0xff]  ;;  %v3275_v7 = vld [vmem:[%s4624_s0 + $0x48] sm:$0xff]  ;;  %v51_v8 = vld [vmem:[%s4624_s0 + $0x40] sm:$0xff]  ;;  %vm1809_vm4 = vcmask 1043456   ;;  %vm1810_vm5 = vcmask 343044   ;;  %vm2028_vm7 = vcmask 1044480  }
  0x1e   :  { %134 = vmatprep.subr.mxu0 %v4628_v0  ;;  %v50_v9 = vld [vmem:[%s4624_s0 + $0x38] sm:$0xff]  ;;  %v49_v10 = vld [vmem:[%s4624_s0 + $0x30] sm:$0xff]  ;;  %v48_v11 = vld [vmem:[%s4624_s0 + $0x28] sm:$0xff]  ;;  %vm1833_vm8 = vcmask 1040384   ;;  %vm1834_vm9 = vcmask 339972  }
  0x1f   :  { %v47_v12 = vld [vmem:[%s4624_s0 + $0x20] sm:$0xff]  ;;  %v46_v13 = vld [vmem:[%s4624_s0 + $0x18] sm:$0xff]  ;;  %v45_v14 = vld [vmem:[%s4624_s0 + $0x10] sm:$0xff] }
  0x20   :  { %v44_v15 = vld [vmem:[%s4624_s0 + $0x8] sm:$0xff]  ;;  %v43_v16 = vld [vmem:[%s4624_s0] sm:$0xff]  ;;  %v62_v19 = vld [vmem:[%s4624_s0 + $0x98] sm:$0xff] }
  0x21   :  { %2427 = vmatpush1.xpose.msk.msra.mxu0 %vm65_vm0, %v3235_v2  ;;  %v64_v17 = vld [vmem:[%s4624_s0 + $0xa8] sm:$0x3]  ;;  %v63_v18 = vld [vmem:[%s4624_s0 + $0xa0] sm:$0xff]  ;;  %v61_v20 = vld [vmem:[%s4624_s0 + $0x90] sm:$0xff] }
  0x22   :  { %136 = vmatprep.subr.mxu0 %v4628_v0  ;;  %v60_v21 = vld [vmem:[%s4624_s0 + $0x88] sm:$0xff]  ;;  %v59_v22 = vld [vmem:[%s4624_s0 + $0x80] sm:$0xff]  ;;  %vm4121_vm6 = vmor %vm1810_vm5, %vm1809_vm4 }
  0x23   :  { %vm4373_vm10 = vmor %vm1834_vm9, %vm1833_vm8 }
  0x25   :  { %2428 = vmatpush1.xpose.msk.msra.mxu0 %vm65_vm0, %v3243_v3 }
  0x26   :  { %138 = vmatprep.subr.mxu0 %v4628_v0 }
  0x29   :  { %2429 = vmatpush1.xpose.msk.msra.mxu0 %vm65_vm0, %v3251_v4 }
  0x2a   :  { %140 = vmatprep.subr.mxu0 %v4628_v0 }
  0x2d   :  { %2430 = vmatpush1.xpose.msk.msra.mxu0 %vm65_vm0, %v3259_v5 }
  0x2e   :  { %142 = vmatprep.subr.mxu0 %v4628_v0 }
  0x31   :  { %2431 = vmatpush1.xpose.msk.msra.mxu0 %vm65_vm0, %v3267_v6 }
  0x32   :  { %144 = vmatprep.subr.mxu0 %v4628_v0 }
  0x35   :  { %2432 = vmatpush1.xpose.msk.msra.mxu0 %vm65_vm0, %v3275_v7 }
  0x36   :  { %146 = vmatprep.subr.mxu0 %v4628_v0 }
  0x39   :  { %2433 = vmatpush1.xpose.msk.msra.mxu0 %vm65_vm0, %v51_v8 }
  0x3a   :  { %148 = vmatprep.subr.mxu0 %v4628_v0 }
  0x3d   :  { %2434 = vmatpush1.xpose.msk.msra.mxu0 %vm65_vm0, %v50_v9 }
  0x3e   :  { %150 = vmatprep.subr.mxu0 %v4628_v0 }
  0x41   :  { %2435 = vmatpush1.xpose.msk.msra.mxu0 %vm65_vm0, %v49_v10 }
  0x42   :  { %152 = vmatprep.subr.mxu0 %v4628_v0 }
  0x45   :  { %2436 = vmatpush1.xpose.msk.msra.mxu0 %vm65_vm0, %v48_v11 }
  0x46   :  { %154 = vmatprep.subr.mxu0 %v4628_v0 }
  0x49   :  { %2437 = vmatpush1.xpose.msk.msra.mxu0 %vm65_vm0, %v47_v12 }
  0x4a   :  { %156 = vmatprep.subr.mxu0 %v4628_v0 }
  0x4d   :  { %2438 = vmatpush1.xpose.msk.msra.mxu0 %vm65_vm0, %v46_v13 }
  0x4e   :  { %158 = vmatprep.subr.mxu0 %v4628_v0 }
  0x51   :  { %2439 = vmatpush1.xpose.msk.msra.mxu0 %vm65_vm0, %v45_v14 }
  0x52   :  { %160 = vmatprep.subr.mxu0 %v4628_v0 }
  0x55   :  { %2440 = vmatpush1.xpose.msk.msra.mxu0 %vm65_vm0, %v44_v15 }
  0x56   :  { %162 = vmatprep.subr.mxu0 %v4628_v0 }
  0x59   :  { %2441 = vmatpush1.xpose.msk.msra.mxu0 %vm65_vm0, %v43_v16 }
  0x5a   :  { %184 = vmatprep.subr.mxu0 %v4628_v0 }
  0x5d   :  { %2442 = vmatpush2.xpose.msk.msra.mxu0 %vm65_vm0, %v64_v17 }
  0x5e   :  { %186 = vmatprep.subr.mxu0 %v4628_v0 }
  0x61   :  { %2443 = vmatpush2.xpose.msk.msra.mxu0 %vm65_vm0, %v63_v18 }
  0x62   :  { %188 = vmatprep.subr.mxu0 %v4628_v0 }
  0x65   :  { %2444 = vmatpush2.xpose.msk.msra.mxu0 %vm65_vm0, %v62_v19 }
  0x66   :  { %190 = vmatprep.subr.mxu0 %v4628_v0 }
  0x69   :  { %2445 = vmatpush2.xpose.msk.msra.mxu0 %vm65_vm0, %v61_v20 }
  0x6a   :  { %192 = vmatprep.subr.mxu0 %v4628_v0 }
  0x6d   :  { %2446 = vmatpush2.xpose.msk.msra.mxu0 %vm65_vm0, %v60_v21 }
  0x6e   :  { %194 = vmatprep.subr.mxu0 %v4628_v0 }
  0x71   :  { %2447 = vmatpush2.xpose.msk.msra.mxu0 %vm65_vm0, %v59_v22 }
  0x74   :  { %2448 = vmatmul.mubr.msk.f32.vlgmr.msra.gmra.mxu0 %vm65_vm0, %v43_v16 }
  0x75   :  { %202 = vmatprep.mubr.f32.mxu0 %v4628_v0 }
  0x78   :  { %2449 = vmatmul.mubr.msk.f32.gmra.mxu0 %vm65_vm0, %v44_v15 }
  0x79   :  { %208 = vmatprep.mubr.f32.mxu0 %v4628_v0 }
  0x7c   :  { %2450 = vmatmul.mubr.msk.f32.gmra.mxu0 %vm65_vm0, %v45_v14 }
  0x7d   :  { %214 = vmatprep.mubr.f32.mxu0 %v4628_v0 }
  0x80   :  { %2451 = vmatmul.mubr.msk.f32.gmra.mxu0 %vm65_vm0, %v46_v13 }
  0x81   :  { %220 = vmatprep.mubr.f32.mxu0 %v4628_v0 }
  0x84   :  { %2452 = vmatmul.mubr.msk.f32.gmra.mxu0 %vm65_vm0, %v47_v12 }
  0x85   :  { %226 = vmatprep.mubr.f32.mxu0 %v4628_v0 }
  0x88   :  { %2453 = vmatmul.mubr.msk.f32.gmra.mxu0 %vm65_vm0, %v48_v11 }
  0x89   :  { %232 = vmatprep.mubr.f32.mxu0 %v4628_v0 }
  0x8c   :  { %2454 = vmatmul.mubr.msk.f32.gmra.mxu0 %vm65_vm0, %v49_v10 }
  0x8d   :  { %238 = vmatprep.mubr.f32.mxu0 %v4628_v0 }
  0x90   :  { %2455 = vmatmul.mubr.msk.f32.gmra.mxu0 %vm65_vm0, %v50_v9 }
  0x91   :  { %244 = vmatprep.mubr.f32.mxu0 %v4628_v0 }
  0x94   :  { %2456 = vmatmul.mubr.msk.f32.gmra.mxu0 %vm65_vm0, %v51_v8 }
  0x95   :  { %250 = vmatprep.mubr.f32.mxu0 %v4628_v0 }
  0x98   :  { %2457 = vmatmul.mubr.msk.f32.gmra.mxu0 %vm65_vm0, %v3275_v7 }
  0x99   :  { %256 = vmatprep.mubr.f32.mxu0 %v4628_v0 }
  0x9c   :  { %2458 = vmatmul.mubr.msk.f32.gmra.mxu0 %vm65_vm0, %v3267_v6 }
  0x9d   :  { %262 = vmatprep.mubr.f32.mxu0 %v4628_v0 }
  0xa0   :  { %2459 = vmatmul.mubr.msk.f32.gmra.mxu0 %vm65_vm0, %v3259_v5 }
  0xa1   :  { %268 = vmatprep.mubr.f32.mxu0 %v4628_v0 }
  0xa4   :  { %2460 = vmatmul.mubr.msk.f32.gmra.mxu0 %vm65_vm0, %v3251_v4 }
  0xa5   :  { %274 = vmatprep.mubr.f32.mxu0 %v4628_v0 }
  0xa8   :  { %2461 = vmatmul.mubr.msk.f32.gmra.mxu0 %vm65_vm0, %v3243_v3 }
  0xa9   :  { %280 = vmatprep.mubr.f32.mxu0 %v4628_v0 }
  0xac   :  { %2462 = vmatmul.mubr.msk.f32.gmra.mxu0 %vm65_vm0, %v3235_v2 }
  0xad   :  { %286 = vmatprep.mubr.f32.mxu0 %v4628_v0 }
  0xb0   :  { %2463 = vmatmul.mubr.msk.f32.gmra.mxu0 %vm65_vm0, %v3227_v1 }
  0xb1   :  { %292 = vmatprep.mubr.f32.mxu0 %v4628_v0 }
  0xb4   :  { %2464 = vmatmul.mubr.msk.f32.gmra.mxu0 %vm65_vm0, %v59_v22 }
  0xb5   :  { %298 = vmatprep.mubr.f32.mxu0 %v4628_v0 }
  0xb8   :  { %2465 = vmatmul.mubr.msk.f32.gmra.mxu0 %vm65_vm0, %v60_v21 }
  0xb9   :  { %304 = vmatprep.mubr.f32.mxu0 %v4628_v0 }
  0xbc   :  { %2466 = vmatmul.mubr.msk.f32.gmra.mxu0 %vm65_vm0, %v61_v20 }
  0xbd   :  { %310 = vmatprep.mubr.f32.mxu0 %v4628_v0 }
  0xc0   :  { %2467 = vmatmul.mubr.msk.f32.gmra.mxu0 %vm65_vm0, %v62_v19 }
  0xc1   :  { %316 = vmatprep.mubr.f32.mxu0 %v4628_v0 }
  0xc4   :  { %2468 = vmatmul.mubr.msk.f32.gmra.mxu0 %vm65_vm0, %v63_v18 }
  0xc5   :  { %322 = vmatprep.mubr.f32.mxu0 %v4628_v0 }
  0xc8   :  { %2469 = vmatmul.mubr.msk.f32.gmra.mxu0 %vm65_vm0, %v64_v17 }
 0x134   :  { %v3404_v23 = vpop.f32.mrf.mxu0 }
 0x136   :  { %v3406_v24 = vpop.f32.mrf.mxu0 }
 0x138   :  { %v3408_v25 = vpop.f32.mrf.mxu0 }
 0x13a   :  { %v3410_v26 = vpop.f32.mrf.mxu0 }
 0x13c   :  { %v3412_v27 = vpop.f32.mrf.mxu0 }
 0x13e   :  { %v3414_v28 = vpop.f32.mrf.mxu0 }
 0x140   :  { %v3416_v29 = vpop.f32.mrf.mxu0 }
 0x142   :  { %v3418_v30 = vpop.f32.mrf.mxu0 }
 0x144   :  { %v3420_v31 = vpop.f32.mrf.mxu0 }
 0x146   :  { %v3422_v32 = vpop.f32.mrf.mxu0 }
 0x148   :  { %v3424_v33 = vpop.f32.mrf.mxu0 }
 0x14a   :  { %v3426_v34 = vpop.f32.mrf.mxu0 }
 0x14b   :  { %v4631_v20 = vmax.f32 %v3426_v34, 0.0 }
 0x14c   :  { %v3428_v35 = vpop.f32.mrf.mxu0 }
 0x14e   :  { %v3430_v36 = vpop.f32.mrf.mxu0 }
 0x150   :  { %v3432_v37 = vpop.f32.mrf.mxu0 }
 0x152   :  { %v3434_v38 = vpop.f32.mrf.mxu0 }
 0x153   :  { %v4630_v9 = vmax.f32 %v3434_v38, 0.0 }
 0x154   :  { %v3436_v39 = vpop.f32.mrf.mxu0 }
 0x155   :  { %v402_v22 = vsel %vm373_vm1, %v4630_v9, -inf  ;;  %v4638_v0 = vmax.f32 %v3436_v39, 0.0 }
 0x156   :  { %v3438_v40 = vpop.f32.mrf.mxu0 }
 0x157   :  { %v4633_v21 = vmax.f32 %v3438_v40, 0.0 }
 0x158   :  { %v3440_v41 = vpop.f32.mrf.mxu0 }
 0x159   :  { %v4646_v13 = vmax.f32 %v3440_v41, 0.0 }
 0x15a   :  { %v3442_v42 = vpop.f32.mrf.mxu0 }
 0x15b   :  { %v4640_v62 = vmax.f32 %v3442_v42, 0.0 }
 0x15c   :  { %v3444_v43 = vpop.f32.mrf.mxu0 }
 0x15d   :  { %v410_v12 = vsel %vm373_vm1, %v4640_v62, -inf  ;;  %v4649_v62 = vmax.f32 %v3420_v31, 0.0 }
 0x15e   :  { %v3446_v44 = vpop.f32.mrf.mxu0  ;;  %v411_v18 = vmax.f32 %v4646_v13, %v410_v12  ;;  %v4639_v12 = vmax.f32 %v3430_v36, 0.0 }
 0x15f   :  { %v4632_v10 = vmax.f32 %v3446_v44, 0.0 }
 0x160   :  { %v3448_v45 = vpop.f32.mrf.mxu0 }
 0x161   :  { %v4655_v2 = vmax.f32 %v3448_v45, 0.0 }
 0x162   :  { %v3450_v46 = vpop.f32.mrf.mxu0 }
 0x163   :  { %v4653_v55 = vmax.f32 %v3450_v46, 0.0 }
 0x164   :  { %v3452_v47 = vpop.f32.mrf.mxu0 }
 0x165   :  { %v353_v50 = vmax.f32 %v3452_v47, 0.0  ;;  %v418_v1 = vsel %vm373_vm1, %v4653_v55, -inf }
 0x166   :  { %v3454_v48 = vpop.f32.mrf.mxu0  ;;  %v419_v7 = vmax.f32 %v4655_v2, %v418_v1 }
 0x167   :  { %v354_v49 = vmax.f32 %v3454_v48, 0.0 }
 0x168   :  { %v3458_v51 = vpop.f32.mrf.mxu0 }
 0x169   :  { %v422_v52 = vsel %vm373_vm1, %v354_v49, -inf  ;;  %v355_v57 = vmax.f32 %v3458_v51, 0.0 }
 0x16a   :  { %v3463_v53 = vpop.f32.mrf.mxu0  ;;  %v423_v54 = vmax.f32 %v353_v50, %v422_v52  ;;  %v414_v52 = vsel %vm373_vm1, %v4632_v10, -inf  ;;  %v4643_v10 = vmax.f32 %v3410_v26, 0.0 }
 0x16b   :  { %v356_v56 = vmax.f32 %v3463_v53, 0.0 }
 0x16c   :  { %424 = vmax.xlane.f32.xlu1 %v423_v54  ;;  %v3470_v58 = vpop.f32.mrf.mxu0  ;;  %v4634_v54 = vmax.f32 %v3432_v37, 0.0 }
 0x16d   :  { %v426_v59 = vsel %vm373_vm1, %v356_v56, -inf  ;;  %v4658_v3 = vmax.f32 %v3470_v58, 0.0 }
 0x16e   :  { %v3475_v60 = vpop.f32.mrf.mxu0  ;;  %v427_v61 = vmax.f32 %v355_v57, %v426_v59  ;;  %v4635_v59 = vmax.f32 %v3444_v43, 0.0 }
 0x16f   :  { %v4654_v63 = vmax.f32 %v3475_v60, 0.0 }
 0x170   :  { %428 = vmax.xlane.f32.xlu1 %v427_v61  ;;  %v3486_v4 = vpop.f32.mrf.mxu0 }
 0x171   :  { %v430_v5 = vsel %vm373_vm1, %v4654_v63, -inf  ;;  %v4652_v14 = vmax.f32 %v3486_v4, 0.0 }
 0x172   :  { %v3491_v6 = vpop.f32.mrf.mxu0  ;;  %v431_v8 = vmax.f32 %v4658_v3, %v430_v5  ;;  %v403_v5 = vmax.f32 %v4634_v54, %v402_v22 }
 0x173   :  { %v4645_v11 = vmax.f32 %v3491_v6, 0.0 }
 0x174   :  { %420 = vmax.xlane.f32.xlu1 %v419_v7  ;;  %432 = vmax.xlane.f32.xlu0 %v431_v8  ;;  %v3505_v15 = vpop.f32.mrf.mxu0  ;;  %v415_v7 = vmax.f32 %v4635_v59, %v414_v52  ;;  %v4637_v8 = vmax.f32 %v3418_v30, 0.0  ;;  %v4642_v59 = vmax.f32 %v3428_v35, 0.0 }
 0x175   :  { %v434_v16 = vsel %vm373_vm1, %v4645_v11, -inf  ;;  %v4650_v11 = vmax.f32 %v3412_v27, 0.0 }
 0x176   :  { %v3510_v17 = vpop.f32.mrf.mxu0  ;;  %v435_v19 = vmax.f32 %v4652_v14, %v434_v16  ;;  %v394_v16 = vsel %vm373_vm1, %v4631_v20, -inf  ;;  %v386_v54 = vsel %vm373_vm1, %v4637_v8, -inf }
 0x178   :  { %412 = vmax.xlane.f32.xlu1 %v411_v18  ;;  %436 = vmax.xlane.f32.xlu0 %v435_v19  ;;  %v3526_v61 = vpop.f32.mrf.mxu0  ;;  %v406_v18 = vsel %vm373_vm1, %v4633_v21, -inf  ;;  %v4636_v19 = vmax.f32 %v3424_v33, 0.0  ;;  %v4644_v21 = vmax.f32 %v3422_v32, 0.0 }
 0x179   :  { %v407_v20 = vmax.f32 %v4638_v0, %v406_v18  ;;  %v4648_v0 = vmax.f32 %v3414_v28, 0.0 }
 0x17a   :  { %v3528_v1 = vpop.f32.mrf.mxu0  ;;  %v395_v9 = vmax.f32 %v4636_v19, %v394_v16 }
 0x17b   :  { %v4662_v63 = vmax.f32 %v3528_v1, 0.0 }
 0x17c   :  { %404 = vmax.xlane.f32.xlu1 %v403_v5  ;;  %416 = vmax.xlane.f32.xlu0 %v415_v7  ;;  %v3544_v22 = vpop.f32.mrf.mxu0  ;;  %v398_v5 = vsel %vm373_vm1, %v4639_v12, -inf  ;;  %v4641_v7 = vmax.f32 %v3416_v29, 0.0  ;;  %v378_v12 = vsel %vm373_vm1, %v4643_v10, -inf }
 0x17d   :  { %v399_v8 = vmax.f32 %v4642_v59, %v398_v5  ;;  %v4651_v5 = vmax.f32 %v3406_v24, 0.0  ;;  %v365_v3 = vmax.f32 %v3544_v22, 0.0 }
 0x17e   :  { %v3546_v52 = vpop.f32.mrf.mxu0  ;;  %v387_v19 = vmax.f32 %v4641_v7, %v386_v54 }
 0x17f   :  { %v4661_v2 = vmax.f32 %v3546_v52, 0.0 }
 0x180   :  { %396 = vmax.xlane.f32.xlu1 %v395_v9  ;;  %408 = vmax.xlane.f32.xlu0 %v407_v20  ;;  %v3562_v16 = vpop.f32.mrf.mxu0  ;;  %v390_v9 = vsel %vm373_vm1, %v4644_v21, -inf  ;;  %v4647_v20 = vmax.f32 %v3408_v25, 0.0  ;;  %v382_v21 = vsel %vm373_vm1, %v4648_v0, -inf }
 0x181   :  { %v391_v10 = vmax.f32 %v4649_v62, %v390_v9  ;;  %v374_v9 = vsel %vm373_vm1, %v4651_v5, -inf  ;;  %v4665_v62 = vmax.f32 %v3404_v23, 0.0 }
 0x182   :  { %v3564_v18 = vpop.f32.mrf.mxu0  ;;  %v379_v59 = vmax.f32 %v4647_v20, %v378_v12  ;;  %v383_v12 = vmax.f32 %v4650_v11, %v382_v21  ;;  %v4660_v11 = vmax.f32 %v3562_v16, 0.0 }
 0x183   :  { %v4663_v20 = vmax.f32 %v3564_v18, 0.0  ;;  %v375_v14 = vmax.f32 %v4665_v62, %v374_v9 }
 0x184   :  { %388 = vmax.xlane.f32.xlu1 %v387_v19  ;;  %400 = vmax.xlane.f32.xlu0 %v399_v8  ;;  %v3579_v54 = vpop.f32.mrf.mxu0 }
 0x185   :  { %v4664_v5 = vmax.f32 %v3579_v54, 0.0 }
 0x186   :  { %v3582_v7 = vpop.f32.mrf.mxu0 }
 0x188   :  { %380 = vmax.xlane.f32.xlu1 %v379_v59  ;;  %392 = vmax.xlane.f32.xlu0 %v391_v10  ;;  %v3592_v8 = vpop.f32.mrf.mxu0  ;;  %v4659_v59 = vmax.f32 %v3582_v7, 0.0 }
 0x189   :  { %v4657_v19 = vmax.f32 %v3592_v8, 0.0 }
 0x18a   :  { %v3595_v13 = vpop.f32.mrf.mxu0 }
 0x18b   :  { %v4656_v10 = vmax.f32 %v3595_v13, 0.0  ;;  %v459_v0 = vsel %vm458_vm2, %v4657_v19, -inf  ;;  %v4666_v19 = vmax.f32 %v3526_v61, 0.0 }
 0x18c   :  { %384 = vmax.xlane.f32.xlu0 %v383_v12  ;;  %v454_v12 = vsel %vm373_vm1, %v4659_v59, -inf  ;;  %v446_v59 = vsel %vm373_vm1, %v4661_v2, -inf }
 0x18d   :  { %v461_v21 = vsel %vm460_vm3, %v4656_v10, -inf  ;;  %v450_v10 = vsel %vm373_vm1, %v4663_v20, -inf  ;;  %v783_v20 = vld [vmem:[#allocation2 + $0xf8] sm:$0xff] }
 0x18e   :  { %v462_v55 = vmax.f32 %v459_v0, %v461_v21  ;;  %v455_v0 = vmax.f32 %v4664_v5, %v454_v12  ;;  %v451_v9 = vmax.f32 %v4660_v11, %v450_v10  ;;  %v4667_v21 = vmax.f32 %v3510_v17, 0.0 }
 0x18f   :  { %v447_v12 = vmax.f32 %v365_v3, %v446_v59 }
 0x190   :  { %376 = vmax.xlane.f32.xlu0 %v375_v14  ;;  %463 = vmax.xlane.f32.xlu1 %v462_v55  ;;  %v442_v55 = vsel %vm373_vm1, %v4662_v63, -inf  ;;  %v4668_v14 = vmax.f32 %v3505_v15, 0.0  ;;  %v438_v11 = vsel %vm373_vm1, %v4667_v21, -inf }
 0x191   :  { %v443_v10 = vmax.f32 %v4666_v19, %v442_v55  ;;  %v915_v19 = vsub.f32 1.0, %v783_v20 }
 0x192   :  { %v439_v2 = vmax.f32 %v4668_v14, %v438_v11 }
 0x194   :  { %456 = vmax.xlane.f32.xlu0 %v455_v0  ;;  %452 = vmax.xlane.f32.xlu1 %v451_v9  ;;  %v781_v0 = vld [vmem:[#allocation2 + $0xe8] sm:$0xff]  ;;  %v780_v9 = vld [vmem:[#allocation2 + $0xe0] sm:$0xff] }
 0x195   :  { %v913_v63 = vsub.f32 1.0, %v781_v0  ;;  %v912_v62 = vsub.f32 1.0, %v780_v9  ;;  %2663 = vlog2.f32 %v781_v0  ;;  %v4697_v0 = vmax.f32 %v3448_v45, 0.0  ;;  %v3665_v45 = vld [vmem:[#allocation2 + $0xd8] sm:$0xff] }
 0x197   :  { %2665 = vlog2.f32 %v913_v63 }
 0x198   :  { %448 = vmax.xlane.f32.xlu0 %v447_v12  ;;  %444 = vmax.xlane.f32.xlu1 %v443_v10  ;;  %v782_v12 = vld [vmem:[#allocation2 + $0xf0] sm:$0xff]  ;;  %2667 = vlog2.f32 %v780_v9 }
 0x199   :  { %2669 = vlog2.f32 %v912_v62  ;;  %v914_v47 = vsub.f32 1.0, %v782_v12 }
 0x19a   :  { %2671 = vlog2.f32 %v783_v20 }
 0x19b   :  { %2673 = vlog2.f32 %v915_v19 }
 0x19c   :  { %440 = vmax.xlane.f32.xlu0 %v439_v2  ;;  %2675 = vlog2.f32 %v782_v12 }
 0x1f5   :  { %v425_v5 = vpop.xlane.xlu1 %424 }
 0x1f6   :  { %v489_v59 = vsub.f32 %v353_v50, %v425_v5  ;;  %v490_v55 = vsub.f32 %v354_v49, %v425_v5  ;;  %v4696_v5 = vmax.f32 %v3470_v58, 0.0  ;;  %v4700_v58 = vmax.f32 %v3486_v4, 0.0 }
 0x1f8   :  { %v557_v10 = vmul.f32 1.442695, %v489_v59  ;;  %v559_v2 = vmul.f32 1.442695, %v490_v55 }
 0x1f9   :  { %v429_v11 = vpop.xlane.xlu1 %428 }
 0x1fa   :  { %v491_v21 = vsub.f32 %v355_v57, %v429_v11  ;;  %v492_v14 = vsub.f32 %v356_v56, %v429_v11  ;;  %2677 = vpow2.f32 %v557_v10  ;;  %v4698_v57 = vmax.f32 %v3475_v60, 0.0  ;;  %v777_v56 = vld [vmem:[#allocation2 + $0xc8] sm:$0xff]  ;;  %v2664_v60 = vpop.eup %2663 }
 0x1fb   :  { %2679 = vpow2.f32 %v559_v2  ;;  %v909_v12 = vsub.f32 1.0, %v777_v56  ;;  %v4701_v11 = vmax.f32 %v3440_v41, 0.0 }
 0x1fc   :  { %v561_v48 = vmul.f32 1.442695, %v491_v21  ;;  %v563_v63 = vmul.f32 1.442695, %v492_v14  ;;  %2681 = vlog2.f32 %v914_v47  ;;  %v4699_v14 = vmax.f32 %v3450_v46, 0.0 }
 0x1fd   :  { %v421_v49 = vpop.xlane.xlu1 %420  ;;  %v433_v50 = vpop.xlane.xlu0 %432  ;;  %2683 = vlog2.f32 %v777_v56  ;;  %v4702_v47 = vmax.f32 %v3491_v6, 0.0 }
 0x1fe   :  { %v493_v62 = vsub.f32 %v4696_v5, %v433_v50  ;;  %v487_v51 = vsub.f32 %v4697_v0, %v421_v49  ;;  %v494_v53 = vsub.f32 %v4698_v57, %v433_v50  ;;  %2685 = vpow2.f32 %v561_v48  ;;  %v2666_v50 = vpop.eup %2665 }
 0x1ff   :  { %2687 = vpow2.f32 %v563_v63  ;;  %v488_v59 = vsub.f32 %v4699_v14, %v421_v49  ;;  %v2668_v49 = vpop.eup %2667  ;;  %v4704_v57 = vmax.f32 %v3444_v43, 0.0 }
 0x200   :  { %v565_v20 = vmul.f32 1.442695, %v493_v62  ;;  %v567_v19 = vmul.f32 1.442695, %v494_v53  ;;  %v553_v10 = vmul.f32 1.442695, %v487_v51  ;;  %2689 = vlog2.f32 %v3665_v45  ;;  %v3672_v62 = vpop.eup %2669 }
 0x201   :  { %v413_v21 = vpop.xlane.xlu1 %412  ;;  %v437_v9 = vpop.xlane.xlu0 %436  ;;  %v555_v0 = vmul.f32 1.442695, %v488_v59  ;;  %v4703_v51 = vmax.f32 %v3442_v42, 0.0 }
 0x202   :  { %v495_v55 = vsub.f32 %v4700_v58, %v437_v9  ;;  %v483_v2 = vsub.f32 %v4701_v11, %v413_v21  ;;  %v496_v48 = vsub.f32 %v4702_v47, %v437_v9  ;;  %2691 = vpow2.f32 %v565_v20  ;;  %v2672_v53 = vpop.eup %2671 }
 0x203   :  { %2693 = vpow2.f32 %v567_v19  ;;  %v484_v41 = vsub.f32 %v4703_v51, %v413_v21  ;;  %v4705_v20 = vmax.f32 %v3432_v37, 0.0  ;;  %v4706_v19 = vmax.f32 %v3446_v44, 0.0  ;;  %v2674_v58 = vpop.eup %2673 }
 0x204   :  { %v569_v46 = vmul.f32 1.442695, %v495_v55  ;;  %v571_v4 = vmul.f32 1.442695, %v496_v48  ;;  %2695 = vlog2.f32 %v909_v12  ;;  %v545_v56 = vmul.f32 1.442695, %v483_v2  ;;  %v3682_v59 = vpop.eup %2675 }
 0x205   :  { %v405_v63 = vpop.xlane.xlu1 %404  ;;  %v417_v5 = vpop.xlane.xlu0 %416  ;;  %2697 = vpow2.f32 %v553_v10  ;;  %v547_v12 = vmul.f32 1.442695, %v484_v41  ;;  %v4707_v10 = vmax.f32 %v3434_v38, 0.0  ;;  %v4708_v2 = vmax.f32 %v3436_v39, 0.0 }
 0x206   :  { %v485_v6 = vsub.f32 %v4704_v57, %v417_v5  ;;  %v479_v9 = vsub.f32 %v4705_v20, %v405_v63  ;;  %v486_v14 = vsub.f32 %v4706_v19, %v417_v5  ;;  %2699 = vpow2.f32 %v569_v46 }
 0x207   :  { %2701 = vpow2.f32 %v571_v4  ;;  %v3684_v11 = vpop.eup %2677  ;;  %v480_v37 = vsub.f32 %v4707_v10, %v405_v63  ;;  %v4709_v46 = vmax.f32 %v3424_v33, 0.0  ;;  %v4710_v5 = vmax.f32 %v3438_v40, 0.0 }
 0x208   :  { %v549_v55 = vmul.f32 1.442695, %v485_v6  ;;  %v551_v42 = vmul.f32 1.442695, %v486_v14  ;;  %2703 = vpow2.f32 %v555_v0  ;;  %v3690_v47 = vpop.eup %2679  ;;  %v537_v48 = vmul.f32 1.442695, %v479_v9 }
 0x209   :  { %v397_v21 = vpop.xlane.xlu1 %396  ;;  %v409_v43 = vpop.xlane.xlu0 %408  ;;  %2705 = vpow2.f32 %v545_v56  ;;  %v855_v41 = vmul.f32 0.6931472, %v2664_v60  ;;  %v987_v38 = vmul.f32 0.6931472, %v2666_v50  ;;  %v539_v33 = vmul.f32 1.442695, %v480_v37 }
 0x20a   :  { %v481_v44 = vsub.f32 %v4708_v2, %v409_v43  ;;  %v475_v4 = vsub.f32 %v4709_v46, %v397_v21  ;;  %v482_v51 = vsub.f32 %v4710_v5, %v409_v43  ;;  %v3696_v57 = vpop.eup %2681  ;;  %2707 = vpow2.f32 %v549_v55  ;;  %v1089_v46 = vld [vmem:[#allocation4 + $0xe8] sm:$0xff] }
 0x20b   :  { %v3698_v63 = vpop.eup %2683  ;;  %2709 = vpow2.f32 %v551_v42  ;;  %v4711_v9 = vmax.f32 %v3426_v34, 0.0  ;;  %v4712_v19 = vmax.f32 %v3428_v35, 0.0  ;;  %v4713_v50 = vmax.f32 %v3416_v29, 0.0 }
 0x20c   :  { %v541_v0 = vmul.f32 1.442695, %v481_v44  ;;  %v543_v39 = vmul.f32 1.442695, %v482_v51  ;;  %v3700_v56 = vpop.eup %2685  ;;  %2711 = vpow2.f32 %v547_v12  ;;  %v529_v60 = vmul.f32 1.442695, %v475_v4 }
 0x20d   :  { %v389_v6 = vpop.xlane.xlu1 %388  ;;  %v401_v20 = vpop.xlane.xlu0 %400  ;;  %v476_v40 = vsub.f32 %v4711_v9, %v397_v21  ;;  %2713 = vpow2.f32 %v537_v48  ;;  %v4714_v43 = vmax.f32 %v3430_v36, 0.0  ;;  %v1045_v37 = vsub.f32 %v855_v41, %v987_v38 }
 0x20e   :  { %v477_v14 = vsub.f32 %v4712_v19, %v401_v20  ;;  %v3706_v55 = vpop.eup %2687  ;;  %v471_v42 = vsub.f32 %v4713_v50, %v389_v6  ;;  %2715 = vpow2.f32 %v541_v0  ;;  %v3714_v34 = vmul.f32 0.6931472, %v2668_v49 }
 0x20f   :  { %v478_v10 = vsub.f32 %v4714_v43, %v401_v20  ;;  %v3712_v2 = vpop.eup %2689  ;;  %2717 = vpow2.f32 %v543_v39  ;;  %v3718_v48 = vmul.f32 0.6931472, %v2672_v53  ;;  %v531_v36 = vmul.f32 1.442695, %v476_v40 }
 0x210   :  { %v533_v12 = vmul.f32 1.442695, %v477_v14  ;;  %v3716_v21 = vpop.eup %2691  ;;  %2719 = vpow2.f32 %v539_v33  ;;  %v4715_v4 = vmax.f32 %v3420_v31, 0.0  ;;  %v3724_v51 = vmul.f32 0.6931472, %v2674_v58 }
 0x211   :  { %v535_v35 = vmul.f32 1.442695, %v478_v10  ;;  %v393_v44 = vpop.xlane.xlu0 %392  ;;  %v3720_v29 = vpop.eup %2693  ;;  %2721 = vpow2.f32 %v529_v60  ;;  %v521_v49 = vmul.f32 1.442695, %v471_v42  ;;  %v4716_v41 = vmax.f32 %v3422_v32, 0.0 }
 0x212   :  { %v473_v5 = vsub.f32 %v4715_v4, %v393_v44  ;;  %v3726_v0 = vpop.eup %2695  ;;  %v653_v53 = vsel %vm373_vm1, %v3720_v29, 0.0  ;;  %2723 = vpow2.f32 %v533_v12  ;;  %v381_v20 = vpop.xlane.xlu1 %380  ;;  %v645_v31 = vsel %vm373_vm1, %v3690_v47, 0.0 }
 0x213   :  { %v474_v38 = vsub.f32 %v4716_v41, %v393_v44  ;;  %v3732_v39 = vpop.eup %2697  ;;  %v1133_v58 = vadd.f32 %v1089_v46, %v1045_v37  ;;  %v4717_v40 = vmax.f32 %v3418_v30, 0.0  ;;  %2725 = vpow2.f32 %v535_v35 }
 0x214   :  { %v525_v33 = vmul.f32 1.442695, %v473_v5  ;;  %v3736_v9 = vpop.eup %2699  ;;  %v654_v14 = vadd.f32 %v3716_v21, %v653_v53  ;;  %2727 = vpow2.f32 %v531_v36  ;;  %v4718_v42 = vmax.f32 %v3412_v27, 0.0 }
 0x215   :  { %v472_v19 = vsub.f32 %v4717_v40, %v389_v6  ;;  %v527_v32 = vmul.f32 1.442695, %v474_v38  ;;  %v385_v60 = vpop.xlane.xlu0 %384  ;;  %v3741_v50 = vpop.eup %2701  ;;  %v4719_v10 = vmax.f32 %v3414_v28, 0.0  ;;  %v1047_v37 = vsub.f32 %v3718_v48, %v3724_v51 }
 0x216   :  { %v469_v43 = vsub.f32 %v4718_v42, %v385_v60  ;;  %v3749_v44 = vpop.eup %2703  ;;  %2729 = vpow2.f32 %v521_v49  ;;  %v4720_v30 = vmax.f32 %v3408_v25, 0.0  ;;  %655 = vadd.xlane.f32.xlu0 %v654_v14  ;;  %v657_v35 = vsel %vm373_vm1, %v3741_v50, 0.0  ;;  %v1091_v42 = vld [vmem:[#allocation4 + $0xf8] sm:$0xff] }
 0x217   :  { %v470_v12 = vsub.f32 %v4719_v10, %v385_v60  ;;  %v649_v27 = vsel %vm373_vm1, %v3706_v55, 0.0  ;;  %v3757_v46 = vpop.eup %2705  ;;  %2731 = vpow2.f32 %v525_v33  ;;  %v658_v48 = vadd.f32 %v3736_v9, %v657_v35 }
 0x218   :  { %v467_v6 = vsub.f32 %v4720_v30, %v381_v20  ;;  %v517_v28 = vmul.f32 1.442695, %v469_v43  ;;  %v3760_v4 = vpop.eup %2707  ;;  %v523_v5 = vmul.f32 1.442695, %v472_v19  ;;  %v4721_v25 = vmax.f32 %v3410_v26, 0.0 }
 0x219   :  { %v519_v36 = vmul.f32 1.442695, %v470_v12  ;;  %2733 = vpow2.f32 %v527_v32  ;;  %v646_v49 = vadd.f32 %v3684_v11, %v645_v31  ;;  %v377_v41 = vpop.xlane.xlu0 %376  ;;  %v464_v38 = vpop.xlane.xlu1 %463  ;;  %659 = vadd.xlane.f32.xlu1 %v658_v48  ;;  %v4722_v33 = vmax.f32 %v3404_v23, 0.0 }
 0x21a   :  { %v468_v51 = vsub.f32 %v4721_v25, %v381_v20  ;;  %v3765_v53 = vpop.eup %2709  ;;  %2735 = vpow2.f32 %v517_v28  ;;  %v4723_v14 = vmax.f32 %v3406_v24, 0.0  ;;  %v650_v19 = vadd.f32 %v3700_v56, %v649_v27 }
 0x21b   :  { %v465_v40 = vsub.f32 %v4722_v33, %v377_v41  ;;  %v3772_v26 = vpop.eup %2711  ;;  %v513_v20 = vmul.f32 1.442695, %v467_v6  ;;  %2737 = vpow2.f32 %v519_v36  ;;  %647 = vadd.xlane.f32.xlu0 %v646_v49  ;;  %v637_v31 = vsel %vm373_vm1, %v3765_v53, 0.0 }
 0x21c   :  { %v466_v60 = vsub.f32 %v4723_v14, %v377_v41  ;;  %v641_v32 = vsel %vm373_vm1, %v3749_v44, 0.0  ;;  %v3778_v43 = vpop.eup %2713  ;;  %v4725_v24 = vmax.f32 %v3592_v8, 0.0  ;;  %v638_v30 = vadd.f32 %v3760_v4, %v637_v31 }
 0x21d   :  { %4724 = vst [vmem:[#allocation8_spill] sm:$0xff] %v3778_v43  ;;  %v509_v23 = vmul.f32 1.442695, %v465_v40  ;;  %v3783_v35 = vpop.eup %2715  ;;  %2739 = vpow2.f32 %v523_v5  ;;  %v515_v6 = vmul.f32 1.442695, %v468_v51  ;;  %v4726_v27 = vmax.f32 %v3595_v13, 0.0  ;;  %v457_v36 = vpop.xlane.xlu0 %456  ;;  %651 = vadd.xlane.f32.xlu1 %v650_v19 }
 0x21e   :  { %v511_v10 = vmul.f32 1.442695, %v466_v60  ;;  %v507_v12 = vsub.f32 %v4725_v24, %v464_v38  ;;  %v453_v48 = vpop.xlane.xlu1 %452  ;;  %v3787_v25 = vadd.f32 %v1091_v42, %v1047_v37  ;;  %v3789_v49 = vpop.eup %2717  ;;  %v4727_v8 = vmax.f32 %v3579_v54, 0.0 }
 0x21f   :  { %v508_v28 = vsub.f32 %v4726_v27, %v464_v38  ;;  %2741 = vpow2.f32 %v509_v23  ;;  %v4728_v33 = vmax.f32 %v3582_v7, 0.0  ;;  %v2499_v14 = vmul.f32 -1.5, %v1133_v58  ;;  %v3795_v5 = vpop.eup %2719  ;;  %639 = vadd.xlane.f32.xlu0 %v638_v30 }
 0x220   :  { %v505_v41 = vsub.f32 %v4727_v8, %v457_v36  ;;  %4729 = vst [vmem:[#allocation9_spill] sm:$0xff] %v3795_v5  ;;  %2743 = vpow2.f32 %v511_v10  ;;  %v629_v13 = vsel %vm373_vm1, %v3789_v49, 0.0  ;;  %v642_v37 = vadd.f32 %v3732_v39, %v641_v32  ;;  %v3802_v38 = vpop.eup %2721 }
 0x221   :  { %v506_v40 = vsub.f32 %v4728_v33, %v457_v36  ;;  %v633_v51 = vsel %vm373_vm1, %v3772_v26, 0.0  ;;  %4730 = vst [vmem:[#allocation10_spill] sm:$0xff] %v3802_v38  ;;  %2745 = vpow2.f32 %v513_v20  ;;  %v593_v54 = vmul.f32 1.442695, %v507_v12  ;;  %v3804_v19 = vpop.eup %2723  ;;  %v449_v10 = vpop.xlane.xlu0 %448 }
 0x222   :  { %v589_v60 = vmul.f32 1.442695, %v505_v41  ;;  %2747 = vpow2.f32 %v515_v6  ;;  %v595_v58 = vmul.f32 1.442695, %v508_v28  ;;  %v4731_v42 = vmax.f32 %v3564_v18, 0.0  ;;  %v3809_v32 = vpop.eup %2725  ;;  %643 = vadd.xlane.f32.xlu1 %v642_v37  ;;  %v445_v30 = vpop.xlane.xlu1 %444 }
 0x223   :  { %v591_v7 = vmul.f32 1.442695, %v506_v40  ;;  %v630_v23 = vadd.f32 %v3783_v35, %v629_v13  ;;  %v501_v20 = vsub.f32 %v365_v3, %v449_v10  ;;  %v4732_v24 = vmax.f32 %v3546_v52, 0.0  ;;  %v3817_v6 = vpop.eup %2727 }
 0x224   :  { %v504_v31 = vsub.f32 %v4731_v42, %v453_v48  ;;  %2749 = vpow2.f32 %v589_v60  ;;  %v3815_v27 = vmul.f32 1.442695, %v2499_v14  ;;  %4733 = vst [vmem:[#allocation11_spill] sm:$0xff] %v3817_v6  ;;  %v621_v18 = vsel %vm373_vm1, %v3809_v32, 0.0  ;;  %v3824_v22 = vpop.eup %2729 }
 0x225   :  { %v502_v12 = vsub.f32 %v4732_v24, %v449_v10  ;;  %2751 = vpow2.f32 %v591_v7  ;;  %631 = vadd.xlane.f32.xlu0 %v630_v23  ;;  %v634_v28 = vadd.f32 %v3757_v46, %v633_v51  ;;  %v625_v36 = vsel %vm373_vm1, %v3795_v5, 0.0  ;;  %4734 = vst [vmem:[#allocation12_spill] sm:$0xff] %v3824_v22  ;;  %v3828_v33 = vpop.eup %2731  ;;  %v441_v51 = vpop.xlane.xlu0 %440 }
 0x226   :  { %2753 = vpow2.f32 %v593_v54  ;;  %v4735_v3 = vmax.f32 %v3562_v16, 0.0  ;;  %v581_v8 = vmul.f32 1.442695, %v501_v20  ;;  %4736 = vst [vmem:[#allocation13_spill] sm:$0xff] %v3828_v33  ;;  %v587_v40 = vmul.f32 1.442695, %v504_v31  ;;  %v3833_v60 = vpop.eup %2733 }
 0x227   :  { %v583_v41 = vmul.f32 1.442695, %v502_v12  ;;  %2755 = vpow2.f32 %v595_v58  ;;  %v4737_v14 = vmax.f32 %v3528_v1, 0.0  ;;  %v622_v37 = vadd.f32 %v3804_v19, %v621_v18  ;;  %4738 = vst [vmem:[#allocation14_spill] sm:$0xff] %v3833_v60  ;;  %635 = vadd.xlane.f32.xlu1 %v634_v28  ;;  %v3840_v58 = vpop.eup %2735 }
 0x228   :  { %v503_v52 = vsub.f32 %v4735_v3, %v453_v48  ;;  %2757 = vpow2.f32 %v581_v8  ;;  %v4739_v54 = vmax.f32 %v3505_v15, 0.0  ;;  %v4740_v48 = vmax.f32 %v3510_v17, 0.0  ;;  %4741 = vst [vmem:[#allocation15_spill] sm:$0xff] %v3840_v58  ;;  %v3847_v20 = vpop.eup %2737 }
 0x229   :  { %v500_v13 = vsub.f32 %v4737_v14, %v445_v30  ;;  %v985_v42 = vmul.f32 0.6931472, %v3672_v62  ;;  %2759 = vpow2.f32 %v583_v41  ;;  %v4742_v1 = vmax.f32 %v3526_v61, 0.0  ;;  %623 = vadd.xlane.f32.xlu0 %v622_v37  ;;  %4743 = vst [vmem:[#allocation16_spill] sm:$0xff] %v3847_v20  ;;  %v776_v14 = vld [vmem:[#allocation2 + $0xc0] sm:$0xff] }
 0x22a   :  { %v497_v16 = vsub.f32 %v4739_v54, %v441_v51  ;;  %v498_v7 = vsub.f32 %v4740_v48, %v441_v51  ;;  %v613_v23 = vsel %vm373_vm1, %v3833_v60, 0.0  ;;  %v626_v10 = vadd.f32 %v3778_v43, %v625_v36 }
 0x22b   :  { %v499_v31 = vsub.f32 %v4742_v1, %v445_v30  ;;  %v585_v15 = vmul.f32 1.442695, %v503_v52  ;;  %v614_v12 = vadd.f32 %v3828_v33, %v613_v23  ;;  %2761 = vpow2.f32 %v587_v40  ;;  %v3854_v30 = vpop.eup %2739  ;;  %v1065_v33 = vld [vmem:[#allocation4 + $0x28] sm:$0xff] }
 0x22c   :  { %v573_v24 = vmul.f32 1.442695, %v497_v16  ;;  %v575_v17 = vmul.f32 1.442695, %v498_v7  ;;  %v579_v62 = vmul.f32 1.442695, %v500_v13  ;;  %627 = vadd.xlane.f32.xlu1 %v626_v10  ;;  %v1044_v3 = vsub.f32 %v3714_v34, %v985_v42  ;;  %v3859_v52 = vpop.eup %2741 }
 0x22d   :  { %v605_v18 = vsel %vm373_vm1, %v3847_v20, 0.0  ;;  %v617_v61 = vsel %vm373_vm1, %v3817_v6, 0.0  ;;  %4744 = vst [vmem:[#allocation17_spill] sm:$0xff] %v3854_v30  ;;  %v857_v28 = vmul.f32 0.6931472, %v3682_v59  ;;  %4745 = vst [vmem:[#allocation18_spill] sm:$0xff] %v3859_v52  ;;  %615 = vadd.xlane.f32.xlu0 %v614_v12  ;;  %v3863_v13 = vpop.eup %2743 }
 0x22e   :  { %2763 = vpow2.f32 %v573_v24  ;;  %v989_v36 = vmul.f32 0.6931472, %v3696_v57  ;;  %v577_v8 = vmul.f32 1.442695, %v499_v31  ;;  %v606_v41 = vadd.f32 %v3840_v58, %v605_v18  ;;  %4746 = vst [vmem:[#allocation19_spill] sm:$0xff] %v3863_v13  ;;  %v1088_v59 = vld [vmem:[#allocation4 + $0xe0] sm:$0xff]  ;;  %v3868_v51 = vpop.eup %2745 }
 0x22f   :  { %2765 = vpow2.f32 %v575_v17  ;;  %v847_v40 = vmul.f32 0.6931472, %v3698_v63  ;;  %v618_v37 = vadd.f32 %v3802_v38, %v617_v61  ;;  %v911_v57 = vsub.f32 1.0, %v3665_v45  ;;  %4747 = vst [vmem:[#allocation20_spill] sm:$0xff] %v3868_v51  ;;  %v778_v16 = vld [vmem:[#allocation2 + $0xd0] sm:$0xff]  ;;  %v3874_v48 = vpop.eup %2747  ;;  %v1085_v17 = vld [vmem:[#allocation4 + $0xc8] sm:$0xff] }
 0x230   :  { %2767 = vpow2.f32 %v585_v15  ;;  %v979_v34 = vmul.f32 0.6931472, %v3726_v0  ;;  %v597_v54 = vsel %vm373_vm1, %v3863_v13, 0.0  ;;  %v609_v63 = vsel %vm373_vm1, %v3854_v30, 0.0  ;;  %4748 = vst [vmem:[#allocation21_spill] sm:$0xff] %v3874_v48  ;;  %v1090_v31 = vld [vmem:[#allocation4 + $0xf0] sm:$0xff] }
 0x231   :  { %2769 = vpow2.f32 %v579_v62  ;;  %619 = vadd.xlane.f32.xlu1 %v618_v37  ;;  %v2501_v7 = vmul.f32 -1.5, %v3787_v25  ;;  %v1046_v45 = vsub.f32 %v857_v28, %v989_v36  ;;  %v908_v42 = vsub.f32 1.0, %v776_v14  ;;  %v3878_v0 = vpop.eup %2749  ;;  %607 = vadd.xlane.f32.xlu0 %v606_v41  ;;  %v773_v18 = vld [vmem:[#allocation2 + $0xa8] sm:$0xff]  ;;  %v775_v61 = vld [vmem:[#allocation2 + $0xb8] sm:$0xff]  ;;  %v1074_v58 = vld [vmem:[#allocation4 + $0x70] sm:$0xff] }
 0x232   :  { %2771 = vpow2.f32 %v3815_v27  ;;  %4749 = vst [vmem:[#allocation22_spill] sm:$0xff] %v3878_v0  ;;  %v598_v1 = vadd.f32 %v3859_v52, %v597_v54  ;;  %v1132_v23 = vadd.f32 %v1088_v59, %v1044_v3  ;;  %v1041_v10 = vsub.f32 %v847_v40, %v979_v34  ;;  %v3881_v15 = vpop.eup %2751  ;;  %v1071_v6 = vld [vmem:[#allocation4 + $0x58] sm:$0xff] }
 0x233   :  { %2773 = vpow2.f32 %v577_v8  ;;  %4750 = vst [vmem:[#allocation23_spill] sm:$0xff] %v3881_v15  ;;  %v610_v24 = vadd.f32 %v3824_v22, %v609_v63  ;;  %v910_v25 = vsub.f32 1.0, %v778_v16  ;;  %v3884_v12 = vpop.eup %2753  ;;  %v677_v27 = vsel %vm373_vm1, %v3881_v15, 0.0 }
 0x234   :  { %2775 = vlog2.f32 %v911_v57  ;;  %4751 = vst [vmem:[#allocation24_spill] sm:$0xff] %v3884_v12  ;;  %v601_v62 = vsel %vm373_vm1, %v3874_v48, 0.0  ;;  %v3890_v28 = vpop.eup %2755  ;;  %v1299_v36 = vmul.f32 1.442695, %v2501_v7  ;;  %v1134_v3 = vadd.f32 %v1090_v31, %v1046_v45 }
 0x235   :  { %2777 = vlog2.f32 %v776_v14  ;;  %4752 = vst [vmem:[#allocation25_spill] sm:$0xff] %v3890_v28  ;;  %611 = vadd.xlane.f32.xlu1 %v610_v24  ;;  %v3892_v8 = vpop.eup %2757  ;;  %599 = vadd.xlane.f32.xlu0 %v598_v1  ;;  %v678_v41 = vadd.f32 %v3878_v0, %v677_v27  ;;  %v2498_v40 = vmul.f32 -1.5, %v1132_v23  ;;  %v1129_v37 = vadd.f32 %v1085_v17, %v1041_v10 }
 0x236   :  { %2779 = vlog2.f32 %v778_v16  ;;  %4753 = vst [vmem:[#allocation26_spill] sm:$0xff] %v3892_v8  ;;  %v3895_v59 = vpop.eup %2759  ;;  %v602_v14 = vadd.f32 %v3868_v51, %v601_v62  ;;  %v905_v57 = vsub.f32 1.0, %v773_v18  ;;  %v907_v34 = vsub.f32 1.0, %v775_v61 }
 0x237   :  { %2781 = vlog2.f32 %v908_v42  ;;  %4754 = vst [vmem:[#allocation27_spill] sm:$0xff] %v3895_v59  ;;  %v669_v54 = vsel %vm373_vm1, %v3895_v59, 0.0  ;;  %v681_v63 = vsel %vm458_vm2, %v3884_v12, 0.0  ;;  %v682_v16 = vsel %vm460_vm3, %v3890_v28, 0.0  ;;  %v772_v42 = vld [vmem:[#allocation2 + $0xa0] sm:$0xff]  ;;  %v770_v59 = vld [vmem:[#allocation2 + $0x90] sm:$0xff] }
 0x238   :  { %2783 = vlog2.f32 %v910_v25  ;;  %v3904_v7 = vpop.eup %2761  ;;  %v2500_v45 = vmul.f32 -1.5, %v1134_v3  ;;  %v670_v31 = vadd.f32 %v3892_v8, %v669_v54  ;;  %v1293_v23 = vmul.f32 1.442695, %v2498_v40 }
 0x239   :  { %2785 = vlog2.f32 %v773_v18  ;;  %4755 = vst [vmem:[#allocation28_spill] sm:$0xff] %v3904_v7  ;;  %603 = vadd.xlane.f32.xlu1 %v602_v14  ;;  %679 = vadd.xlane.f32.xlu0 %v678_v41  ;;  %v2495_v10 = vmul.f32 -1.5, %v1129_v37  ;;  %v683_v17 = vadd.f32 %v682_v16, %v681_v63  ;;  %v673_v62 = vsel %vm373_vm1, %v3904_v7, 0.0  ;;  %v774_v18 = vld [vmem:[#allocation2 + $0xb0] sm:$0xff]  ;;  %v769_v63 = vld [vmem:[#allocation2 + $0x88] sm:$0xff]  ;;  %v771_v16 = vld [vmem:[#allocation2 + $0x98] sm:$0xff] }
 0x23a   :  { %2787 = vpow2.f32 %v1299_v36  ;;  %v904_v36 = vsub.f32 1.0, %v772_v42  ;;  %v1297_v41 = vmul.f32 1.442695, %v2500_v45  ;;  %v906_v54 = vsub.f32 1.0, %v774_v18  ;;  %v1086_v7 = vld [vmem:[#allocation4 + $0xd0] sm:$0xff] }
 0x23b   :  { %v3906_v1 = vpop.eup %2763  ;;  %2789 = vlog2.f32 %v775_v61  ;;  %v1287_v37 = vmul.f32 1.442695, %v2495_v10  ;;  %v1087_v10 = vld [vmem:[#allocation4 + $0xd8] sm:$0xff] }
 0x23c   :  { %4756 = vst [vmem:[#allocation29_spill] sm:$0xff] %v3906_v1  ;;  %v3909_v24 = vpop.eup %2765  ;;  %2791 = vlog2.f32 %v905_v57 }
 0x23d   :  { %4757 = vst [vmem:[#allocation30_spill] sm:$0xff] %v3909_v24  ;;  %v3911_v25 = vpop.eup %2767  ;;  %v661_v27 = vsel %vm373_vm1, %v3909_v24, 0.0  ;;  %2793 = vlog2.f32 %v907_v34  ;;  %684 = vadd.xlane.f32.xlu1 %v683_v17  ;;  %671 = vadd.xlane.f32.xlu0 %v670_v31  ;;  %v851_v34 = vmul.f32 0.6931472, %v3712_v2  ;;  %v903_v2 = vsub.f32 1.0, %v771_v16 }
 0x23e   :  { %4758 = vst [vmem:[#allocation31_spill] sm:$0xff] %v3911_v25  ;;  %v3917_v3 = vpop.eup %2769  ;;  %2795 = vlog2.f32 %v772_v42  ;;  %v662_v40 = vadd.f32 %v3906_v1, %v661_v27  ;;  %v674_v57 = vadd.f32 %v3911_v25, %v673_v62  ;;  %v901_v62 = vsub.f32 1.0, %v769_v63 }
 0x23f   :  { %4759 = vst [vmem:[#allocation32_spill] sm:$0xff] %v3917_v3  ;;  %v3919_v61 = vpop.eup %2771  ;;  %2797 = vpow2.f32 %v1293_v23  ;;  %v665_v45 = vsel %vm373_vm1, %v3917_v3, 0.0 }
 0x240   :  { %v3922_v14 = vpop.eup %2773  ;;  %2799 = vlog2.f32 %v774_v18 }
 0x241   :  { %4760 = vst [vmem:[#allocation33_spill] sm:$0xff] %v3922_v14  ;;  %v2776_v17 = vpop.eup %2775  ;;  %2801 = vlog2.f32 %v904_v36  ;;  %675 = vadd.xlane.f32.xlu1 %v674_v57  ;;  %663 = vadd.xlane.f32.xlu0 %v662_v40  ;;  %v666_v18 = vadd.f32 %v3922_v14, %v665_v45  ;;  %v768_v40 = vld [vmem:[#allocation2 + $0x80] sm:$0xff] }
 0x242   :  { %v2778_v42 = vpop.eup %2777  ;;  %2803 = vpow2.f32 %v1297_v41  ;;  %v983_v31 = vmul.f32 0.6931472, %v2776_v17  ;;  %v1084_v17 = vld [vmem:[#allocation4 + $0xc0] sm:$0xff] }
 0x243   :  { %v2780_v23 = vpop.eup %2779  ;;  %2805 = vpow2.f32 %v1287_v37  ;;  %v845_v27 = vmul.f32 0.6931472, %v2778_v42 }
 0x244   :  { %v2782_v1 = vpop.eup %2781  ;;  %v1043_v24 = vsub.f32 %v851_v34, %v983_v31  ;;  %v849_v25 = vmul.f32 0.6931472, %v2780_v23  ;;  %2807 = vlog2.f32 %v906_v54  ;;  %v900_v23 = vsub.f32 1.0, %v768_v40 }
 0x245   :  { %v2784_v8 = vpop.eup %2783  ;;  %v977_v3 = vmul.f32 0.6931472, %v2782_v1  ;;  %2809 = vlog2.f32 %v769_v63  ;;  %667 = vadd.xlane.f32.xlu1 %v666_v18  ;;  %v902_v18 = vsub.f32 1.0, %v770_v59 }
 0x246   :  { %v2786_v36 = vpop.eup %2785  ;;  %v1131_v41 = vadd.f32 %v1087_v10, %v1043_v24  ;;  %v981_v57 = vmul.f32 0.6931472, %v2784_v8  ;;  %2811 = vlog2.f32 %v771_v16 }
 0x247   :  { %v2788_v37 = vpop.eup %2787  ;;  %v1040_v42 = vsub.f32 %v845_v27, %v977_v3  ;;  %2813 = vlog2.f32 %v901_v62  ;;  %v839_v31 = vmul.f32 0.6931472, %v2786_v36  ;;  %v1081_v62 = vld [vmem:[#allocation4 + $0xa8] sm:$0xff] }
 0x248   :  { %v2790_v12 = vpop.eup %2789  ;;  %v2497_v45 = vmul.f32 -1.5, %v1131_v41  ;;  %v1042_v34 = vsub.f32 %v849_v25, %v981_v57  ;;  %2815 = vlog2.f32 %v903_v2  ;;  %v1083_v2 = vld [vmem:[#allocation4 + $0xb8] sm:$0xff] }
 0x249   :  { %v2792_v54 = vpop.eup %2791  ;;  %v1128_v1 = vadd.f32 %v1084_v17, %v1040_v42  ;;  %v843_v63 = vmul.f32 0.6931472, %v2790_v12  ;;  %2817 = vlog2.f32 %v768_v40 }
 0x24a   :  { %v2794_v24 = vpop.eup %2793  ;;  %v1291_v8 = vmul.f32 1.442695, %v2497_v45  ;;  %v1130_v10 = vadd.f32 %v1086_v7, %v1042_v34  ;;  %v971_v16 = vmul.f32 0.6931472, %v2792_v54  ;;  %2819 = vlog2.f32 %v770_v59  ;;  %v765_v59 = vld [vmem:[#allocation2 + $0x68] sm:$0xff] }
 0x24b   :  { %v2796_v14 = vpop.eup %2795  ;;  %v2494_v3 = vmul.f32 -1.5, %v1128_v1  ;;  %v975_v27 = vmul.f32 0.6931472, %v2794_v24  ;;  %v1354_v34 = vadd.f32 1.0, %v3919_v61 }
 0x24c   :  { %v2798_v0 = vpop.eup %2797  ;;  %2821 = vpow2.f32 %v1291_v8  ;;  %v2496_v25 = vmul.f32 -1.5, %v1130_v10  ;;  %v1037_v36 = vsub.f32 %v839_v31, %v971_v16  ;;  %v837_v17 = vmul.f32 0.6931472, %v2796_v14  ;;  %v1080_v31 = vld [vmem:[#allocation4 + $0xa0] sm:$0xff] }
 0x24d   :  { %v2800_v41 = vpop.eup %2799  ;;  %v1285_v57 = vmul.f32 1.442695, %v2494_v3  ;;  %v1039_v12 = vsub.f32 %v843_v63, %v975_v27  ;;  %2823 = vlog2.f32 %v900_v23  ;;  %v1356_v8 = vadd.f32 1.0, %v2788_v37  ;;  %v767_v23 = vld [vmem:[#allocation2 + $0x78] sm:$0xff] }
 0x24e   :  { %v2802_v40 = vpop.eup %2801  ;;  %v1289_v42 = vmul.f32 1.442695, %v2496_v25  ;;  %v1125_v7 = vadd.f32 %v1081_v62, %v1037_v36  ;;  %2825 = vlog2.f32 %v902_v18  ;;  %v841_v63 = vmul.f32 0.6931472, %v2800_v41 }
 0x24f   :  { %v2804_v45 = vpop.eup %2803  ;;  %v1127_v54 = vadd.f32 %v1083_v2, %v1039_v12  ;;  %v969_v1 = vmul.f32 0.6931472, %v2802_v40  ;;  %2827 = vpow2.f32 %v1285_v57  ;;  %v897_v18 = vsub.f32 1.0, %v765_v59  ;;  %v1082_v12 = vld [vmem:[#allocation4 + $0xb0] sm:$0xff] }
 0x250   :  { %v2806_v24 = vpop.eup %2805  ;;  %2829 = vpow2.f32 %v1289_v42  ;;  %v2491_v16 = vmul.f32 -1.5, %v1125_v7  ;;  %v1353_v61 = vadd.f32 1.0, %v2798_v0  ;;  %v899_v57 = vsub.f32 1.0, %v767_v23 }
 0x251   :  { %v2808_v10 = vpop.eup %2807  ;;  %v1036_v14 = vsub.f32 %v837_v17, %v969_v1  ;;  %v2493_v27 = vmul.f32 -1.5, %v1127_v54  ;;  %2831 = vlog2.f32 %v765_v59  ;;  %v1355_v59 = vadd.f32 1.0, %v2804_v45 }
 0x252   :  { %v2810_v3 = vpop.eup %2809  ;;  %2833 = vrcp.f32 %v1354_v34  ;;  %v973_v25 = vmul.f32 0.6931472, %v2808_v10  ;;  %v1279_v42 = vmul.f32 1.442695, %v2491_v16 }
 0x253   :  { %v2812_v62 = vpop.eup %2811  ;;  %v1124_v36 = vadd.f32 %v1080_v31, %v1036_v14  ;;  %v831_v37 = vmul.f32 0.6931472, %v2810_v3  ;;  %2835 = vlog2.f32 %v767_v23  ;;  %v1283_v1 = vmul.f32 1.442695, %v2493_v27  ;;  %v1077_v31 = vld [vmem:[#allocation4 + $0x88] sm:$0xff]  ;;  %v1079_v23 = vld [vmem:[#allocation4 + $0x98] sm:$0xff] }
 0x254   :  { %v2814_v2 = vpop.eup %2813  ;;  %2837 = vrcp.f32 %v1356_v8  ;;  %v1038_v41 = vsub.f32 %v841_v63, %v973_v25  ;;  %v835_v54 = vmul.f32 0.6931472, %v2812_v62  ;;  %v1350_v14 = vadd.f32 1.0, %v2806_v24 }
 0x255   :  { %v2816_v40 = vpop.eup %2815  ;;  %v2490_v17 = vmul.f32 -1.5, %v1124_v36  ;;  %v963_v28 = vmul.f32 0.6931472, %v2814_v2  ;;  %2839 = vlog2.f32 %v897_v18 }
 0x256   :  { %v2818_v7 = vpop.eup %2817  ;;  %2841 = vrcp.f32 %v1353_v61  ;;  %v1126_v0 = vadd.f32 %v1082_v12, %v1038_v41  ;;  %v967_v34 = vmul.f32 0.6931472, %v2816_v40  ;;  %v1078_v41 = vld [vmem:[#allocation4 + $0x90] sm:$0xff] }
 0x257   :  { %v2820_v10 = vpop.eup %2819  ;;  %v1277_v3 = vmul.f32 1.442695, %v2490_v17  ;;  %v1033_v15 = vsub.f32 %v831_v37, %v963_v28  ;;  %2843 = vlog2.f32 %v899_v57  ;;  %v829_v25 = vmul.f32 0.6931472, %v2818_v7  ;;  %v1076_v28 = vld [vmem:[#allocation4 + $0x80] sm:$0xff] }
 0x258   :  { %2845 = vpow2.f32 %v1279_v42  ;;  %v2492_v16 = vmul.f32 -1.5, %v1126_v0  ;;  %v1035_v63 = vsub.f32 %v835_v54, %v967_v34  ;;  %v833_v18 = vmul.f32 0.6931472, %v2820_v10  ;;  %v764_v37 = vld [vmem:[#allocation2 + $0x60] sm:$0xff]  ;;  %v766_v0 = vld [vmem:[#allocation2 + $0x70] sm:$0xff] }
 0x259   :  { %v2822_v8 = vpop.eup %2821  ;;  %2847 = vpow2.f32 %v1283_v1  ;;  %v1121_v62 = vadd.f32 %v1077_v31, %v1033_v15  ;;  %v896_v34 = vsub.f32 1.0, %v764_v37 }
 0x25a   :  { %v2824_v27 = vpop.eup %2823  ;;  %2849 = vrcp.f32 %v1355_v59  ;;  %v1281_v61 = vmul.f32 1.442695, %v2492_v16  ;;  %v1123_v36 = vadd.f32 %v1079_v23, %v1035_v63  ;;  %v1352_v40 = vadd.f32 1.0, %v2822_v8 }
 0x25b   :  { %v2826_v45 = vpop.eup %2825  ;;  %v961_v2 = vmul.f32 0.6931472, %v2824_v27  ;;  %2851 = vpow2.f32 %v1277_v3  ;;  %v2487_v24 = vmul.f32 -1.5, %v1121_v62 }
 0x25c   :  { %v965_v12 = vmul.f32 0.6931472, %v2826_v45  ;;  %v2828_v57 = vpop.eup %2827  ;;  %2853 = vrcp.f32 %v1350_v14  ;;  %v2489_v7 = vmul.f32 -1.5, %v1123_v36 }
 0x25d   :  { %v1032_v42 = vsub.f32 %v829_v25, %v961_v2  ;;  %v2830_v17 = vpop.eup %2829  ;;  %2855 = vpow2.f32 %v1281_v61  ;;  %v1271_v15 = vmul.f32 1.442695, %v2487_v24  ;;  %v1349_v10 = vadd.f32 1.0, %v2828_v57 }
 0x25e   :  { %v1034_v1 = vsub.f32 %v833_v18, %v965_v12  ;;  %v2832_v54 = vpop.eup %2831  ;;  %2857 = vlog2.f32 %v764_v37  ;;  %v1351_v14 = vadd.f32 1.0, %v2830_v17  ;;  %v1275_v63 = vmul.f32 1.442695, %v2489_v7  ;;  %v761_v37 = vld [vmem:[#allocation2 + $0x48] sm:$0xff]  ;;  %v1075_v17 = vld [vmem:[#allocation4 + $0x78] sm:$0xff] }
 0x25f   :  { %v1120_v59 = vadd.f32 %v1076_v28, %v1032_v42  ;;  %v3930_v31 = vpop.eup %2833  ;;  %2859 = vlog2.f32 %v766_v0  ;;  %v823_v27 = vmul.f32 0.6931472, %v2832_v54  ;;  %v898_v2 = vsub.f32 1.0, %v766_v0  ;;  %v1073_v28 = vld [vmem:[#allocation4 + $0x68] sm:$0xff]  ;;  %v763_v54 = vld [vmem:[#allocation2 + $0x58] sm:$0xff] }
 0x260   :  { %v1122_v3 = vadd.f32 %v1078_v41, %v1034_v1  ;;  %v2836_v23 = vpop.eup %2835  ;;  %2861 = vrcp.f32 %v1352_v40 }
 0x261   :  { %v2486_v8 = vmul.f32 -1.5, %v1120_v59  ;;  %v2838_v16 = vpop.eup %2837  ;;  %2863 = vpow2.f32 %v1271_v15  ;;  %v827_v61 = vmul.f32 0.6931472, %v2836_v23  ;;  %v893_v59 = vsub.f32 1.0, %v761_v37 }
 0x262   :  { %v2488_v25 = vmul.f32 -1.5, %v1122_v3  ;;  %v2840_v62 = vpop.eup %2839  ;;  %2865 = vlog2.f32 %v896_v34 }
 0x263   :  { %v1269_v18 = vmul.f32 1.442695, %v2486_v8  ;;  %v3932_v45 = vpop.eup %2841  ;;  %2867 = vrcp.f32 %v1349_v10  ;;  %v955_v36 = vmul.f32 0.6931472, %v2840_v62  ;;  %v760_v8 = vld [vmem:[#allocation2 + $0x40] sm:$0xff] }
 0x264   :  { %v2844_v24 = vpop.eup %2843  ;;  %2869 = vrcp.f32 %v1351_v14  ;;  %v1273_v12 = vmul.f32 1.442695, %v2488_v25 }
 0x265   :  { %v2846_v57 = vpop.eup %2845  ;;  %2871 = vpow2.f32 %v1275_v63  ;;  %v959_v40 = vmul.f32 0.6931472, %v2844_v24  ;;  %v1029_v42 = vsub.f32 %v823_v27, %v955_v36  ;;  %v3938_v63 = vld [vmem:[#allocation2 + $0x50] sm:$0xff]  ;;  %v895_v27 = vsub.f32 1.0, %v763_v54  ;;  %v3942_v36 = vld [vmem:[#allocation2 + $0x20] sm:$0xff] }
 0x266   :  { %v2848_v41 = vpop.eup %2847  ;;  %2873 = vpow2.f32 %v1269_v18  ;;  %v1346_v34 = vadd.f32 1.0, %v2846_v57  ;;  %v3947_v57 = vld [vmem:[#allocation2 + $0x30] sm:$0xff] }
 0x267   :  { %v3934_v7 = vpop.eup %2849  ;;  %v1031_v15 = vsub.f32 %v827_v61, %v959_v40  ;;  %v1117_v1 = vadd.f32 %v1073_v28, %v1029_v42  ;;  %2875 = vlog2.f32 %v898_v2  ;;  %v1348_v3 = vadd.f32 1.0, %v2848_v41  ;;  %v3940_v61 = vld [vmem:[#allocation2 + $0x28] sm:$0xff]  ;;  %v1072_v28 = vld [vmem:[#allocation4 + $0x60] sm:$0xff] }
 0x268   :  { %v2852_v0 = vpop.eup %2851  ;;  %2877 = vpow2.f32 %v1273_v12  ;;  %v892_v12 = vsub.f32 1.0, %v760_v8  ;;  %v1486_v42 = vmul.f32 1.2, %v3930_v31 }
 0x269   :  { %v3936_v10 = vpop.eup %2853  ;;  %v1119_v23 = vadd.f32 %v1075_v17, %v1031_v15  ;;  %v2483_v14 = vmul.f32 -1.5, %v1117_v1  ;;  %2879 = vlog2.f32 %v761_v37  ;;  %v1345_v18 = vadd.f32 1.0, %v2852_v0  ;;  %v3945_v37 = vld [vmem:[#allocation2 + $0x38] sm:$0xff]  ;;  %v3952_v15 = vld [vmem:[#allocation2 + $0x8] sm:$0xff] }
 0x26a   :  { %v2856_v25 = vpop.eup %2855  ;;  %2881 = vlog2.f32 %v763_v54  ;;  %v1488_v54 = vmul.f32 1.2, %v2838_v16  ;;  %v1530_v0 = vadd.f32 -0.1, %v1486_v42 }
 0x26b   :  { %v2858_v62 = vpop.eup %2857  ;;  %2883 = vlog2.f32 %v893_v59  ;;  %v1263_v24 = vmul.f32 1.442695, %v2483_v14  ;;  %v1347_v41 = vadd.f32 1.0, %v2856_v25  ;;  %v2485_v17 = vmul.f32 -1.5, %v1119_v23 }
 0x26c   :  { %v2860_v2 = vpop.eup %2859  ;;  %2885 = vrcp.f32 %v1346_v34  ;;  %v821_v59 = vmul.f32 0.6931472, %v2858_v62  ;;  %v3955_v34 = vld [vmem:[#allocation2 + $0x18] sm:$0xff]  ;;  %v1485_v23 = vmul.f32 1.2, %v3932_v45  ;;  %v3971_v45 = vld [vmem:[#allocation2 + $0x10] sm:$0xff] }
 0x26d   :  { %v3949_v40 = vpop.eup %2861  ;;  %2887 = vrcp.f32 %v1348_v3  ;;  %v3969_v31 = vadd.f32 -0.1, %v1488_v54  ;;  %v1487_v25 = vmul.f32 1.2, %v3934_v7  ;;  %v825_v22 = vmul.f32 0.6931472, %v2860_v2 }
 0x26e   :  { %v2864_v1 = vpop.eup %2863  ;;  %2889 = vlog2.f32 %v895_v27  ;;  %v3964_v27 = vld [vmem:[#allocation2] sm:$0xff]  ;;  %v1482_v54 = vmul.f32 1.2, %v3936_v10  ;;  %v1574_v7 = vmax.f32 %v1530_v0, 0.0 }
 0x26f   :  { %v2866_v14 = vpop.eup %2865  ;;  %2891 = vrcp.f32 %v1345_v18  ;;  %v1267_v18 = vmul.f32 1.442695, %v2485_v17  ;;  %v1342_v48 = vadd.f32 1.0, %v2864_v1  ;;  %v1529_v17 = vadd.f32 -0.1, %v1485_v23 }
 0x270   :  { %v3960_v3 = vpop.eup %2867  ;;  %2893 = vpow2.f32 %v1263_v24  ;;  %v953_v16 = vmul.f32 0.6931472, %v2866_v14  ;;  %v3973_v24 = vld [vmem:[#allocation2 + $0x148] sm:$0xff]  ;;  %v1576_v2 = vmax.f32 %v3969_v31, 0.0  ;;  %v1531_v23 = vadd.f32 -0.1, %v1487_v25 }
 0x271   :  { %v3966_v62 = vpop.eup %2869  ;;  %2895 = vrcp.f32 %v1347_v41 }
 0x272   :  { %v2872_v52 = vpop.eup %2871  ;;  %v1028_v13 = vsub.f32 %v821_v59, %v953_v16  ;;  %2897 = vlog2.f32 %v760_v8  ;;  %v4763_v59 = vsub.f32 1.0, %v3945_v37 }
 0x273   :  { %v2874_v14 = vpop.eup %2873  ;;  %2899 = vlog2.f32 %v3938_v63  ;;  %v1344_v0 = vadd.f32 1.0, %v2872_v52  ;;  %v4762_v52 = vsub.f32 1.0, %v3940_v61 }
 0x274   :  { %v2876_v41 = vpop.eup %2875  ;;  %v1116_v51 = vadd.f32 %v1072_v28, %v1028_v13  ;;  %2901 = vlog2.f32 %v892_v12  ;;  %v4761_v13 = vsub.f32 1.0, %v3938_v63  ;;  %v1573_v28 = vmax.f32 %v1529_v17, 0.0  ;;  %v1069_v17 = vld [vmem:[#allocation4 + $0x48] sm:$0xff] }
 0x275   :  { %v2878_v1 = vpop.eup %2877  ;;  %2903 = vpow2.f32 %v1267_v18  ;;  %v957_v8 = vmul.f32 0.6931472, %v2876_v41  ;;  %v1526_v18 = vadd.f32 -0.1, %v1482_v54  ;;  %v1341_v63 = vadd.f32 1.0, %v2874_v14 }
 0x276   :  { %v2880_v30 = vpop.eup %2879  ;;  %2905 = vrcp.f32 %v1342_v48  ;;  %v2482_v42 = vmul.f32 -1.5, %v1116_v51  ;;  %v3988_v51 = vld [vmem:[#allocation2 + $0x158] sm:$0x3]  ;;  %v1343_v54 = vadd.f32 1.0, %v2878_v1 }
 0x277   :  { %v2882_v20 = vpop.eup %2881  ;;  %v1030_v38 = vsub.f32 %v825_v22, %v957_v8  ;;  %v815_v10 = vmul.f32 0.6931472, %v2880_v30  ;;  %2907 = vlog2.f32 %v4761_v13  ;;  %v1484_v30 = vmul.f32 1.2, %v3949_v40 }
 0x278   :  { %v2884_v12 = vpop.eup %2883  ;;  %v1261_v41 = vmul.f32 1.442695, %v2482_v42  ;;  %2909 = vlog2.f32 %v3940_v61  ;;  %v819_v25 = vmul.f32 0.6931472, %v2882_v20  ;;  %v4004_v61 = vmin.f32 %v1573_v28, 1.0 }
 0x279   :  { %v3985_v16 = vpop.eup %2885  ;;  %v1118_v31 = vadd.f32 %v1074_v58, %v1030_v38  ;;  %v947_v48 = vmul.f32 0.6931472, %v2884_v12  ;;  %2911 = vlog2.f32 %v3945_v37  ;;  %v3995_v58 = vmin.f32 %v1574_v7, 1.0 }
 0x27a   :  { %v3990_v22 = vpop.eup %2887  ;;  %2913 = vpow2.f32 %v1261_v41  ;;  %v1575_v41 = vmax.f32 %v1531_v23, 0.0  ;;  %v1570_v37 = vmax.f32 %v1526_v18, 0.0  ;;  %v1481_v23 = vmul.f32 1.2, %v3960_v3 }
 0x27b   :  { %v2890_v42 = vpop.eup %2889  ;;  %v2484_v8 = vmul.f32 -1.5, %v1118_v31  ;;  %v1025_v13 = vsub.f32 %v815_v10, %v947_v48  ;;  %2915 = vlog2.f32 %v4762_v52  ;;  %v4002_v10 = vmin.f32 %v1576_v2, 1.0 }
 0x27c   :  { %v2892_v38 = vpop.eup %2891  ;;  %v951_v12 = vmul.f32 0.6931472, %v2890_v42  ;;  %2917 = vlog2.f32 %v4763_v59  ;;  %v4006_v42 = vadd.f32 -0.1, %v1484_v30  ;;  %v1483_v30 = vmul.f32 1.2, %v3966_v62 }
 0x27d   :  { %v2894_v14 = vpop.eup %2893  ;;  %2919 = vrcp.f32 %v1344_v0  ;;  %v1265_v20 = vmul.f32 1.442695, %v2484_v8  ;;  %v1113_v1 = vadd.f32 %v1069_v17, %v1025_v13  ;;  %v4009_v13 = vmin.f32 %v1575_v41, 1.0 }
 0x27e   :  { %v4000_v31 = vpop.eup %2895  ;;  %2921 = vrcp.f32 %v1341_v63  ;;  %v1027_v7 = vsub.f32 %v819_v25, %v951_v12  ;;  %v1338_v0 = vadd.f32 1.0, %v2894_v14  ;;  %v1572_v3 = vmax.f32 %v4006_v42, 0.0  ;;  %v1068_v14 = vld [vmem:[#allocation4 + $0x40] sm:$0xff] }
 0x27f   :  { %v2898_v48 = vpop.eup %2897  ;;  %2923 = vrcp.f32 %v1343_v54  ;;  %v2479_v59 = vmul.f32 -1.5, %v1113_v1  ;;  %v4017_v12 = vmin.f32 %v1570_v37, 1.0  ;;  %v1478_v62 = vmul.f32 1.2, %v3985_v16 }
 0x280   :  { %v2900_v52 = vpop.eup %2899  ;;  %2925 = vpow2.f32 %v1265_v20  ;;  %v1115_v17 = vadd.f32 %v1071_v6, %v1027_v7  ;;  %v813_v28 = vmul.f32 0.6931472, %v2898_v48  ;;  %v1525_v20 = vadd.f32 -0.1, %v1481_v23 }
 0x281   :  { %v2902_v8 = vpop.eup %2901  ;;  %v1255_v2 = vmul.f32 1.442695, %v2479_v59  ;;  %2927 = vlog2.f32 %v3942_v36  ;;  %v817_v6 = vmul.f32 0.6931472, %v2900_v52  ;;  %v4022_v42 = vadd.f32 -0.1, %v1483_v30 }
 0x282   :  { %v2904_v63 = vpop.eup %2903  ;;  %v2481_v25 = vmul.f32 -1.5, %v1115_v17  ;;  %v945_v18 = vmul.f32 0.6931472, %v2902_v8  ;;  %2929 = vlog2.f32 %v3947_v57  ;;  %v4764_v8 = vsub.f32 1.0, %v3942_v36  ;;  %v1070_v52 = vld [vmem:[#allocation4 + $0x50] sm:$0xff] }
 0x283   :  { %v4014_v54 = vpop.eup %2905  ;;  %2931 = vpow2.f32 %v1255_v2  ;;  %v1340_v59 = vadd.f32 1.0, %v2904_v63  ;;  %v1480_v37 = vmul.f32 1.2, %v3990_v22  ;;  %v1569_v63 = vmax.f32 %v1525_v20, 0.0 }
 0x284   :  { %v2908_v41 = vpop.eup %2907  ;;  %2933 = vrcp.f32 %v1338_v0  ;;  %v1259_v1 = vmul.f32 1.442695, %v2481_v25  ;;  %v1024_v7 = vsub.f32 %v813_v28, %v945_v18  ;;  %v1477_v0 = vmul.f32 1.2, %v2892_v38 }
 0x285   :  { %v2910_v48 = vpop.eup %2909  ;;  %v949_v17 = vmul.f32 0.6931472, %v2908_v41  ;;  %2935 = vlog2.f32 %v4764_v8  ;;  %v4765_v18 = vsub.f32 1.0, %v3947_v57  ;;  %v1522_v8 = vadd.f32 -0.1, %v1478_v62 }
 0x286   :  { %v2912_v40 = vpop.eup %2911  ;;  %2937 = vpow2.f32 %v1259_v1  ;;  %v1112_v2 = vadd.f32 %v1068_v14, %v1024_v7  ;;  %v807_v28 = vmul.f32 0.6931472, %v2910_v48  ;;  %v1524_v7 = vadd.f32 -0.1, %v1480_v37 }
 0x287   :  { %v2914_v23 = vpop.eup %2913  ;;  %v1026_v25 = vsub.f32 %v817_v6, %v949_v17  ;;  %2939 = vlog2.f32 %v4765_v18  ;;  %v811_v36 = vmul.f32 0.6931472, %v2912_v40  ;;  %v1521_v48 = vadd.f32 -0.1, %v1477_v0  ;;  %v1067_v40 = vld [vmem:[#allocation4 + $0x38] sm:$0xff] }
 0x288   :  { %v2916_v16 = vpop.eup %2915  ;;  %v2478_v41 = vmul.f32 -1.5, %v1112_v2  ;;  %2941 = vlog2.f32 %v3952_v15  ;;  %v4766_v2 = vsub.f32 1.0, %v3952_v15  ;;  %v4036_v18 = vmin.f32 %v1572_v3, 1.0 }
 0x289   :  { %v2918_v30 = vpop.eup %2917  ;;  %2943 = vrcp.f32 %v1340_v59  ;;  %v1114_v22 = vadd.f32 %v1070_v52, %v1026_v25  ;;  %v939_v1 = vmul.f32 0.6931472, %v2916_v16  ;;  %v1479_v59 = vmul.f32 1.2, %v4000_v31 }
 0x28a   :  { %v2920_v14 = vpop.eup %2919  ;;  %v1253_v38 = vmul.f32 1.442695, %v2478_v41  ;;  %v943_v6 = vmul.f32 0.6931472, %v2918_v30  ;;  %2945 = vlog2.f32 %v3955_v34  ;;  %v1337_v52 = vadd.f32 1.0, %v2914_v23 }
 0x28b   :  { %v4029_v57 = vpop.eup %2921  ;;  %v2480_v20 = vmul.f32 -1.5, %v1114_v22  ;;  %v1021_v17 = vsub.f32 %v807_v28, %v939_v1  ;;  %2947 = vlog2.f32 %v4766_v2  ;;  %v1571_v16 = vmax.f32 %v4022_v42, 0.0 }
 0x28c   :  { %v4033_v62 = vpop.eup %2923  ;;  %2949 = vpow2.f32 %v1253_v38  ;;  %v1023_v37 = vsub.f32 %v811_v36, %v943_v6  ;;  %v4039_v28 = vmin.f32 %v1569_v63, 1.0  ;;  %v4767_v1 = vsub.f32 1.0, %v3955_v34 }
 0x28d   :  { %v2926_v25 = vpop.eup %2925  ;;  %v1257_v41 = vmul.f32 1.442695, %v2480_v20  ;;  %v1109_v0 = vadd.f32 %v1065_v33, %v1021_v17  ;;  %v1566_v31 = vmax.f32 %v1522_v8, 0.0  ;;  %v1568_v23 = vmax.f32 %v1524_v7, 0.0 }
 0x28e   :  { %v2928_v30 = vpop.eup %2927  ;;  %v1339_v22 = vadd.f32 1.0, %v2926_v25  ;;  %v1111_v15 = vadd.f32 %v1067_v40, %v1023_v37  ;;  %2951 = vlog2.f32 %v4767_v1  ;;  %v4043_v3 = vadd.f32 -0.1, %v1479_v59 }
 0x28f   :  { %v2930_v2 = vpop.eup %2929  ;;  %2953 = vpow2.f32 %v1257_v41  ;;  %v2475_v36 = vmul.f32 -1.5, %v1109_v0  ;;  %v1565_v6 = vmax.f32 %v1521_v48, 0.0  ;;  %v805_v17 = vmul.f32 0.6931472, %v2928_v30  ;;  %v1064_v30 = vld [vmem:[#allocation4 + $0x20] sm:$0xff] }
 0x290   :  { %v2932_v38 = vpop.eup %2931  ;;  %2955 = vrcp.f32 %v1337_v52  ;;  %v2477_v42 = vmul.f32 -1.5, %v1111_v15  ;;  %v1474_v34 = vmul.f32 1.2, %v4014_v54  ;;  %v1476_v37 = vmul.f32 1.2, %v2920_v14 }
 0x291   :  { %v2934_v33 = vpop.eup %2933  ;;  %2957 = vrcp.f32 %v1339_v22  ;;  %v1334_v63 = vadd.f32 1.0, %v2932_v38  ;;  %v1247_v20 = vmul.f32 1.442695, %v2475_v36  ;;  %v4047_v7 = vmin.f32 %v1571_v16, 1.0 }
 0x292   :  { %v2936_v40 = vpop.eup %2935  ;;  %v1251_v25 = vmul.f32 1.442695, %v2477_v42  ;;  %2959 = vlog2.f32 %v3964_v27  ;;  %v809_v59 = vmul.f32 0.6931472, %v2930_v2  ;;  %v4049_v41 = vmin.f32 %v1566_v31, 1.0  ;;  %v1066_v42 = vld [vmem:[#allocation4 + $0x30] sm:$0xff] }
 0x293   :  { %v2938_v8 = vpop.eup %2937  ;;  %2961 = vrcp.f32 %v1334_v63  ;;  %v937_v48 = vmul.f32 0.6931472, %v2936_v40  ;;  %v4051_v0 = vmin.f32 %v1568_v23, 1.0  ;;  %v4053_v54 = vmin.f32 %v1565_v6, 1.0 }
 0x294   :  { %v2940_v52 = vpop.eup %2939  ;;  %v1336_v22 = vadd.f32 1.0, %v2938_v8  ;;  %2963 = vpow2.f32 %v1247_v20  ;;  %v1567_v16 = vmax.f32 %v4043_v3, 0.0  ;;  %v1518_v38 = vadd.f32 -0.1, %v1474_v34 }
 0x295   :  { %v2942_v15 = vpop.eup %2941  ;;  %2965 = vpow2.f32 %v1251_v25  ;;  %v941_v14 = vmul.f32 0.6931472, %v2940_v52  ;;  %v1020_v1 = vsub.f32 %v805_v17, %v937_v48  ;;  %v1520_v2 = vadd.f32 -0.1, %v1476_v37 }
 0x296   :  { %v2944_v36 = vpop.eup %2943  ;;  %2967 = vrcp.f32 %v1336_v22  ;;  %v799_v40 = vmul.f32 0.6931472, %v2942_v15  ;;  %v1473_v6 = vmul.f32 1.2, %v4029_v57  ;;  %v1475_v25 = vmul.f32 1.2, %v4033_v62 }
 0x297   :  { %v2946_v31 = vpop.eup %2945  ;;  %v1022_v63 = vsub.f32 %v809_v59, %v941_v14  ;;  %v1108_v23 = vadd.f32 %v1064_v30, %v1020_v1  ;;  %2969 = vlog2.f32 %v3971_v45  ;;  %v1470_v8 = vmul.f32 1.2, %v2934_v33  ;;  %v1061_v15 = vld [vmem:[#allocation4 + $0x8] sm:$0xff] }
 0x298   :  { %v2948_v20 = vpop.eup %2947  ;;  %v4768_v17 = vsub.f32 1.0, %v3964_v27  ;;  %v4769_v52 = vsub.f32 1.0, %v3971_v45  ;;  %v1472_v59 = vmul.f32 1.2, %v2944_v36  ;;  %v803_v30 = vmul.f32 0.6931472, %v2946_v31 }
 0x299   :  { %v2950_v3 = vpop.eup %2949  ;;  %v1110_v34 = vadd.f32 %v1066_v42, %v1022_v63  ;;  %v2474_v37 = vmul.f32 -1.5, %v1108_v23  ;;  %v931_v48 = vmul.f32 0.6931472, %v2948_v20  ;;  %v1562_v1 = vmax.f32 %v1518_v38, 0.0  ;;  %v1063_v38 = vld [vmem:[#allocation4 + $0x18] sm:$0xff] }
 0x29a   :  { %2971 = vlog2.f32 %v4768_v17  ;;  %v1333_v22 = vadd.f32 1.0, %v2950_v3  ;;  %v1564_v42 = vmax.f32 %v1520_v2, 0.0  ;;  %v1517_v17 = vadd.f32 -0.1, %v1473_v6 }
 0x29b   :  { %2973 = vlog2.f32 %v4769_v52  ;;  %v2952_v57 = vpop.eup %2951  ;;  %v2476_v14 = vmul.f32 -1.5, %v1110_v34  ;;  %v1245_v62 = vmul.f32 1.442695, %v2474_v37  ;;  %v1017_v33 = vsub.f32 %v799_v40, %v931_v48 }
 0x29c   :  { %2975 = vlog2.f32 %v3973_v24  ;;  %v2954_v27 = vpop.eup %2953  ;;  %v935_v63 = vmul.f32 0.6931472, %v2952_v57  ;;  %v1519_v3 = vadd.f32 -0.1, %v1475_v25  ;;  %v4770_v34 = vsub.f32 1.0, %v3973_v24 }
 0x29d   :  { %2977 = vlog2.f32 %v3988_v51  ;;  %v2956_v23 = vpop.eup %2955  ;;  %v1335_v45 = vadd.f32 1.0, %v2954_v27  ;;  %v1249_v36 = vmul.f32 1.442695, %v2476_v14  ;;  %v1105_v20 = vadd.f32 %v1061_v15, %v1017_v33 }
 0x29e   :  { %2979 = vrcp.f32 %v1333_v22  ;;  %v2958_v31 = vpop.eup %2957  ;;  %v1019_v52 = vsub.f32 %v803_v30, %v935_v63  ;;  %v1514_v37 = vadd.f32 -0.1, %v1470_v8  ;;  %v1516_v48 = vadd.f32 -0.1, %v1472_v59 }
 0x29f   :  { %2981 = vpow2.f32 %v1245_v62  ;;  %v2960_v40 = vpop.eup %2959  ;;  %v2471_v2 = vmul.f32 -1.5, %v1105_v20  ;;  %v4067_v57 = vmin.f32 %v1567_v16, 1.0  ;;  %v4069_v27 = vmin.f32 %v1562_v1, 1.0  ;;  %v656_v16 = vpop.xlane.xlu0 %655 }
 0x2a0   :  { %2983 = vlog2.f32 %v4770_v34  ;;  %v2962_v22 = vpop.eup %2961  ;;  %v1469_v14 = vmul.f32 1.2, %v2956_v23  ;;  %v4071_v6 = vmin.f32 %v1564_v42, 1.0  ;;  %v1471_v25 = vmul.f32 1.2, %v2958_v31 }
 0x2a1   :  { %2985 = vrcp.f32 %v1335_v45  ;;  %v2964_v15 = vpop.eup %2963  ;;  %v1239_v30 = vmul.f32 1.442695, %v2471_v2  ;;  %v4771_v24 = vsub.f32 1.0, %v3988_v51  ;;  %v1561_v59 = vmax.f32 %v1517_v17, 0.0 }
 0x2a2   :  { %2987 = vpow2.f32 %v1249_v36  ;;  %v2966_v8 = vpop.eup %2965  ;;  %v1563_v62 = vmax.f32 %v1519_v3, 0.0  ;;  %v1330_v33 = vadd.f32 1.0, %v2964_v15  ;;  %v1107_v63 = vadd.f32 %v1063_v38, %v1019_v52  ;;  %v660_v15 = vpop.xlane.xlu1 %659 }
 0x2a3   :  { %2989 = vlog2.f32 %v4771_v24  ;;  %v2968_v45 = vpop.eup %2967  ;;  %v1558_v20 = vmax.f32 %v1514_v37, 0.0  ;;  %v1560_v1 = vmax.f32 %v1516_v48, 0.0  ;;  %v1332_v34 = vadd.f32 1.0, %v2966_v8 }
 0x2a4   :  { %2991 = vpow2.f32 %v1239_v30  ;;  %v2970_v23 = vpop.eup %2969  ;;  %v1513_v42 = vadd.f32 -0.1, %v1469_v14  ;;  %v1466_v36 = vmul.f32 1.2, %v2962_v22  ;;  %v797_v31 = vmul.f32 0.6931472, %v2960_v40  ;;  %v648_v30 = vpop.xlane.xlu0 %647 }
 0x2a5   :  { %2993 = vrcp.f32 %v656_v16  ;;  %v4075_v60 = vadd.f32 -0.1, %v1471_v25  ;;  %v1468_v51 = vmul.f32 1.2, %v2968_v45  ;;  %v801_v17 = vmul.f32 0.6931472, %v2970_v23 }
 0x2a6   :  { %2995 = vrcp.f32 %v1330_v33  ;;  %v4077_v52 = vmin.f32 %v1561_v59, 1.0  ;;  %v2473_v37 = vmul.f32 -1.5, %v1107_v63  ;;  %v4079_v24 = vmin.f32 %v1563_v62, 1.0  ;;  %v1060_v14 = vld [vmem:[#allocation4] sm:$0xff]  ;;  %v1062_v59 = vld [vmem:[#allocation4 + $0x10] sm:$0xff] }
 0x2a7   :  { %v2972_v2 = vpop.eup %2971  ;;  %2997 = vrcp.f32 %v1332_v34  ;;  %v4081_v22 = vmin.f32 %v1558_v20, 1.0  ;;  %v4083_v8 = vmin.f32 %v1560_v1, 1.0  ;;  %v1510_v33 = vadd.f32 -0.1, %v1466_v36  ;;  %v652_v20 = vpop.xlane.xlu1 %651 }
 0x2a8   :  { %v2974_v3 = vpop.eup %2973  ;;  %v929_v48 = vmul.f32 0.6931472, %v2972_v2  ;;  %2999 = vrcp.f32 %v660_v15  ;;  %v1557_v34 = vmax.f32 %v1513_v42, 0.0  ;;  %v1559_v63 = vmax.f32 %v4075_v60, 0.0  ;;  %v4086_v15 = vld [vmem:[#allocation2 + $0x140] sm:$0xff]  ;;  %v640_v36 = vpop.xlane.xlu0 %639 }
 0x2a9   :  { %v2976_v38 = vpop.eup %2975  ;;  %4772 = vst [vmem:[#allocation34_spill] sm:$0xff] %v4081_v22  ;;  %v933_v40 = vmul.f32 0.6931472, %v2974_v3  ;;  %3001 = vrcp.f32 %v648_v30  ;;  %4773 = vst [vmem:[#allocation35_spill] sm:$0xff] %v4083_v8  ;;  %v1512_v23 = vadd.f32 -0.1, %v1468_v51 }
 0x2aa   :  { %v2978_v25 = vpop.eup %2977  ;;  %v1016_v45 = vsub.f32 %v797_v31, %v929_v48  ;;  %4774 = vst [vmem:[#allocation36_spill] sm:$0xff] %v4086_v15  ;;  %v1243_v43 = vmul.f32 1.442695, %v2473_v37  ;;  %3003 = vlog2.f32 %v4086_v15  ;;  %v879_v48 = vmul.f32 0.6931472, %v2976_v38 }
 0x2ab   :  { %v2980_v16 = vpop.eup %2979  ;;  %v1018_v2 = vsub.f32 %v801_v17, %v933_v40  ;;  %3005 = vrcp.f32 %v652_v20  ;;  %v1554_v51 = vmax.f32 %v1510_v33, 0.0  ;;  %v1556_v5 = vmax.f32 %v1512_v23, 0.0 }
 0x2ac   :  { %v2982_v62 = vpop.eup %2981  ;;  %v1465_v3 = vmul.f32 1.2, %v2980_v16  ;;  %v1104_v30 = vadd.f32 %v1060_v14, %v1016_v45  ;;  %3007 = vrcp.f32 %v640_v36  ;;  %v644_v14 = vpop.xlane.xlu1 %643  ;;  %v4089_v45 = vmin.f32 %v1557_v34, 1.0  ;;  %v1101_v34 = vld [vmem:[#allocation4 + $0x148] sm:$0xff] }
 0x2ad   :  { %v2984_v1 = vpop.eup %2983  ;;  %v1329_v31 = vadd.f32 1.0, %v2982_v62  ;;  %v1106_v42 = vadd.f32 %v1062_v59, %v1018_v2  ;;  %v4093_v2 = vld [vmem:[#allocation2 + $0x150] sm:$0x3]  ;;  %v4095_v23 = vmin.f32 %v1559_v63, 1.0 }
 0x2ae   :  { %v2986_v60 = vpop.eup %2985  ;;  %v1509_v17 = vadd.f32 -0.1, %v1465_v3  ;;  %v1011_v40 = vmul.f32 0.6931472, %v2984_v1  ;;  %v2470_v16 = vmul.f32 -1.5, %v1104_v30  ;;  %v632_v62 = vpop.xlane.xlu0 %631  ;;  %v4097_v30 = vmin.f32 %v1554_v51, 1.0 }
 0x2af   :  { %v2988_v8 = vpop.eup %2987  ;;  %v1467_v22 = vmul.f32 1.2, %v2986_v60  ;;  %3009 = vrcp.f32 %v1329_v31  ;;  %v2472_v20 = vmul.f32 -1.5, %v1106_v42  ;;  %v4099_v1 = vmul.f32 0.6931472, %v2978_v25 }
 0x2b0   :  { %v2990_v37 = vpop.eup %2989  ;;  %v1331_v15 = vadd.f32 1.0, %v2988_v8  ;;  %3011 = vpow2.f32 %v1243_v43  ;;  %v1553_v59 = vmax.f32 %v1509_v17, 0.0  ;;  %v1057_v33 = vsub.f32 %v879_v48, %v1011_v40  ;;  %v636_v42 = vpop.xlane.xlu1 %635 }
 0x2b1   :  { %3013 = vrcp.f32 %v644_v14  ;;  %v4091_v38 = vadd.f32 -0.1, %v1467_v22  ;;  %v2992_v3 = vpop.eup %2991  ;;  %v4101_v43 = vmin.f32 %v1556_v5, 1.0  ;;  %v1237_v36 = vmul.f32 1.442695, %v2470_v16 }
 0x2b2   :  { %3015 = vrcp.f32 %v632_v62  ;;  %v2994_v8 = vpop.eup %2993  ;;  %v4103_v22 = vmul.f32 0.6931472, %v2990_v37  ;;  %v4107_v63 = vmul.f32 1.442695, %v2472_v20  ;;  %v624_v51 = vpop.xlane.xlu0 %623  ;;  %v4111_v17 = vmin.f32 %v1553_v59, 1.0 }
 0x2b3   :  { %3017 = vrcp.f32 %v1331_v15  ;;  %v2996_v31 = vpop.eup %2995  ;;  %v730_v48 = vmul.f32 %v2994_v8, %v3720_v29  ;;  %v729_v60 = vmul.f32 %v2994_v8, %v3716_v21  ;;  %v1555_v5 = vmax.f32 %v4091_v38, 0.0 }
 0x2b4   :  { %3019 = vlog2.f32 %v4093_v2  ;;  %v2998_v25 = vpop.eup %2997  ;;  %v1145_v15 = vadd.f32 %v1101_v34, %v1057_v33  ;;  %v4115_v37 = vadd.f32 1.0, %v2992_v3  ;;  %v1059_v59 = vsub.f32 %v4099_v1, %v4103_v22  ;;  %v4789_v22 = vld [vmem:[#allocation36_spill] sm:$0xff] }
 0x2b5   :  { %3021 = vrcp.f32 %v636_v42  ;;  %v3000_v40 = vpop.eup %2999  ;;  %v1662_v16 = vmul.f32 %v3995_v58, %v730_v48  ;;  %v1661_v29 = vmul.f32 %v4004_v61, %v729_v60  ;;  %v628_v58 = vpop.xlane.xlu1 %627  ;;  %v1462_v34 = vmul.f32 1.2, %v2996_v31 }
 0x2b6   :  { %3023 = vrcp.f32 %v624_v51  ;;  %v3002_v21 = vpop.eup %3001  ;;  %v733_v14 = vmul.f32 %v3000_v40, %v3741_v50  ;;  %v732_v20 = vmul.f32 %v3000_v40, %v3736_v9  ;;  %v616_v9 = vpop.xlane.xlu0 %615  ;;  %v1464_v48 = vmul.f32 1.2, %v2998_v25 }
 0x2b7   :  { %3025 = vpow2.f32 %v1237_v36  ;;  %v2628_v33 = vpack.c.bf16 %v1662_v16, %v1661_v29  ;;  %v724_v61 = vmul.f32 %v3002_v21, %v3690_v47  ;;  %v723_v3 = vmul.f32 %v3002_v21, %v3684_v11  ;;  %v4129_v50 = vpop.eup %3003 }
 0x2b8   :  { %3027 = vrcp.f32 %v628_v58  ;;  %v1664_v8 = vmul.f32 %v4002_v10, %v733_v14  ;;  %v1663_v42 = vmul.f32 %v4009_v13, %v732_v20  ;;  %v3006_v36 = vpop.eup %3005  ;;  %v4140_v31 = vmul.f32 -1.5, %v1145_v15 }
 0x2b9   :  { %3029 = vrcp.f32 %v616_v9  ;;  %1826 = vst.msk [vmem:[%s4627_s3 + $0x70] sm:$0xff] %vm4121_vm6, %v2628_v33  ;;  %v1658_v11 = vmul.f32 %v4017_v12, %v724_v61  ;;  %v1657_v47 = vmul.f32 %v4039_v28, %v723_v3  ;;  %v3008_v60 = vpop.eup %3007  ;;  %v727_v25 = vmul.f32 %v3006_v36, %v3706_v55 }
 0x2ba   :  { %v4142_v51 = vpack.c.bf16 %v1664_v8, %v1662_v16  ;;  %v4144_v10 = vpack.c.bf16 %v1663_v42, %v1661_v29  ;;  %v2629_v13 = vpack.c.bf16 %v1664_v8, %v1663_v42  ;;  %v620_v21 = vpop.xlane.xlu1 %619  ;;  %v726_v14 = vmul.f32 %v3006_v36, %v3700_v56  ;;  %v608_v15 = vpop.xlane.xlu0 %607 }
 0x2bb   :  { %v2626_v20 = vpack.c.bf16 %v1658_v11, %v1657_v47  ;;  %v718_v58 = vmul.f32 %v3008_v60, %v3765_v53  ;;  %v717_v12 = vmul.f32 %v3008_v60, %v3760_v4  ;;  %3031 = vrcp.f32 %v620_v21 }
 0x2bc   :  { %v3010_v40 = vpop.eup %3009  ;;  %2034 = vmatprep.subr.bf16.mxu1 %v4142_v51  ;;  %1827 = vst.msk [vmem:[%s4627_s3 + $0x78] sm:$0xff] %vm4121_vm6, %v2629_v13  ;;  %v1660_v55 = vmul.f32 %v4036_v18, %v727_v25  ;;  %v4159_v56 = vadd.f32 -0.1, %v1462_v34  ;;  %v4161_v16 = vadd.f32 -0.1, %v1464_v48  ;;  %3033 = vrcp.f32 %v608_v15 }
 0x2bd   :  { %v4150_v28 = vpop.eup %3011  ;;  %2035 = vmatpush1.bf16.msra.mxu1 %v4144_v10  ;;  %v1659_v4 = vmul.f32 %v4047_v7, %v726_v14  ;;  %1824 = vst.msk [vmem:[%s4627_s3 + $0x60] sm:$0xff] %vm4121_vm6, %v2626_v20  ;;  %v1654_v29 = vmul.f32 %v4049_v41, %v718_v58  ;;  %v1653_v18 = vmul.f32 %v4053_v54, %v717_v12  ;;  %v1461_v9 = vmul.f32 1.2, %v3010_v40  ;;  %v4777_v58 = vld [vmem:[#allocation34_spill] sm:$0xff] }
 0x2be   :  { %v3014_v53 = vpop.eup %3013  ;;  %v4172_v61 = vpack.c.bf16 %v1660_v55, %v1658_v11  ;;  %v612_v7 = vpop.xlane.xlu1 %611 }
 0x2bf   :  { %v3016_v33 = vpop.eup %3015  ;;  %v721_v3 = vmul.f32 %v3014_v53, %v3749_v44  ;;  %v720_v34 = vmul.f32 %v3014_v53, %v3732_v39  ;;  %v4176_v42 = vpack.c.bf16 %v1659_v4, %v1657_v47  ;;  %v2627_v48 = vpack.c.bf16 %v1660_v55, %v1659_v4  ;;  %v4778_v4 = vld [vmem:[#allocation9_spill] sm:$0xff] }
 0x2c0   :  { %v3018_v8 = vpop.eup %3017  ;;  %v2624_v36 = vpack.c.bf16 %v1654_v29, %v1653_v18  ;;  %v712_v60 = vmul.f32 %v3016_v33, %v3789_v49  ;;  %3035 = vrcp.f32 %v612_v7  ;;  %2036 = vmatprep.subr.bf16.mxu1 %v4172_v61  ;;  %v711_v39 = vmul.f32 %v3016_v33, %v3783_v35 }
 0x2c1   :  { %v4179_v13 = vpop.eup %3019  ;;  %v1656_v41 = vmul.f32 %v4051_v0, %v721_v3  ;;  %v1655_v44 = vmul.f32 %v4067_v57, %v720_v34  ;;  %1825 = vst.msk [vmem:[%s4627_s3 + $0x68] sm:$0xff] %vm4121_vm6, %v2627_v48  ;;  %2037 = vmatpush1.bf16.msra.mxu1 %v4176_v42  ;;  %v4199_v35 = vmin.f32 %v1555_v5, 1.0  ;;  %v1463_v0 = vmul.f32 1.2, %v3018_v8  ;;  %v4781_v34 = vld [vmem:[#allocation13_spill] sm:$0xff]  ;;  %v4782_v8 = vld [vmem:[#allocation35_spill] sm:$0xff] }
 0x2c2   :  { %v3022_v54 = vpop.eup %3021  ;;  %1822 = vst.msk [vmem:[%s4627_s3 + $0x50] sm:$0xff] %vm4121_vm6, %v2624_v36  ;;  %v1650_v49 = vmul.f32 %v4069_v27, %v712_v60  ;;  %3037 = vrcp.f32 %v4115_v37  ;;  %v1649_v27 = vmul.f32 %v4077_v52, %v711_v39  ;;  %v1550_v37 = vmax.f32 %v4159_v56, 0.0 }
 0x2c3   :  { %v3024_v57 = vpop.eup %3023  ;;  %v4202_v11 = vpack.c.bf16 %v1656_v41, %v1654_v29  ;;  %v4204_v47 = vpack.c.bf16 %v1655_v44, %v1653_v18  ;;  %v2625_v25 = vpack.c.bf16 %v1656_v41, %v1655_v44  ;;  %v715_v40 = vmul.f32 %v3022_v54, %v3772_v26  ;;  %v600_v41 = vpop.xlane.xlu0 %599 }
 0x2c4   :  { %v4207_v21 = vpop.eup %3025  ;;  %v714_v14 = vmul.f32 %v3022_v54, %v3757_v46  ;;  %v706_v38 = vmul.f32 %v3024_v57, %v3809_v32  ;;  %v705_v5 = vmul.f32 %v3024_v57, %v3804_v19  ;;  %v1552_v46 = vmax.f32 %v4161_v16, 0.0 }
 0x2c5   :  { %2038 = vmatprep.subr.bf16.mxu1 %v4202_v11  ;;  %1823 = vst.msk [vmem:[%s4627_s3 + $0x58] sm:$0xff] %vm4121_vm6, %v2625_v25  ;;  %v1652_v26 = vmul.f32 %v4071_v6, %v715_v40  ;;  %v1505_v20 = vadd.f32 -0.1, %v1461_v9  ;;  %v3028_v52 = vpop.eup %3027  ;;  %v2622_v32 = vpack.c.bf16 %v1650_v49, %v1649_v27  ;;  %v1507_v15 = vadd.f32 -0.1, %v1463_v0  ;;  %v4779_v6 = vld [vmem:[#allocation8_spill] sm:$0xff] }
 0x2c6   :  { %2039 = vmatpush1.bf16.msra.mxu1 %v4204_v47  ;;  %v1651_v19 = vmul.f32 %v4079_v24, %v714_v14  ;;  %v1646_v12 = vmul.f32 %v4777_v58, %v706_v38  ;;  %v3030_v55 = vpop.eup %3029  ;;  %v709_v29 = vmul.f32 %v3028_v52, %v4778_v4  ;;  %v708_v18 = vmul.f32 %v3028_v52, %v4779_v6  ;;  %v4780_v24 = vld [vmem:[#allocation14_spill] sm:$0xff]  ;;  %v4783_v40 = vld [vmem:[#allocation11_spill] sm:$0xff]  ;;  %v4787_v6 = vld [vmem:[#allocation17_spill] sm:$0xff] }
 0x2c7   :  { %v4225_v53 = vpack.c.bf16 %v1652_v26, %v1650_v49  ;;  %v1645_v56 = vmul.f32 %v4089_v45, %v705_v5  ;;  %1820 = vst.msk [vmem:[%s4627_s3 + $0x40] sm:$0xff] %vm4121_vm6, %v2622_v32  ;;  %v700_v3 = vmul.f32 %v3030_v55, %v4780_v24  ;;  %v699_v9 = vmul.f32 %v3030_v55, %v4781_v34  ;;  %v4785_v5 = vld [vmem:[#allocation16_spill] sm:$0xff] }
 0x2c8   :  { %v4230_v16 = vpack.c.bf16 %v1651_v19, %v1649_v27  ;;  %v2623_v33 = vpack.c.bf16 %v1652_v26, %v1651_v19  ;;  %v1648_v7 = vmul.f32 %v4782_v8, %v709_v29  ;;  %v1647_v48 = vmul.f32 %v4095_v23, %v708_v18  ;;  %v3032_v60 = vpop.eup %3031  ;;  %v604_v27 = vpop.xlane.xlu1 %603 }
 0x2c9   :  { %2040 = vmatprep.subr.bf16.mxu1 %v4225_v53  ;;  %v2620_v45 = vpack.c.bf16 %v1646_v12, %v1645_v56  ;;  %v1549_v36 = vmax.f32 %v1505_v20, 0.0  ;;  %v1642_v44 = vmul.f32 %v4097_v30, %v700_v3  ;;  %v1641_v39 = vmul.f32 %v4111_v17, %v699_v9  ;;  %v3034_v0 = vpop.eup %3033  ;;  %v4784_v30 = vld [vmem:[#allocation10_spill] sm:$0xff]  ;;  %v680_v3 = vpop.xlane.xlu0 %679 }
 0x2ca   :  { %1821 = vst.msk [vmem:[%s4627_s3 + $0x48] sm:$0xff] %vm4121_vm6, %v2623_v33  ;;  %2041 = vmatpush1.bf16.msra.mxu1 %v4230_v16  ;;  %v1594_v54 = vmin.f32 %v1550_v37, 1.0  ;;  %v1551_v49 = vmax.f32 %v1507_v15, 0.0  ;;  %v4250_v23 = vpack.c.bf16 %v1648_v7, %v1646_v12  ;;  %v4252_v57 = vpack.c.bf16 %v1647_v48, %v1645_v56  ;;  %v4786_v37 = vld [vmem:[#allocation15_spill] sm:$0xff]  ;;  %v4788_v56 = vld [vmem:[#allocation12_spill] sm:$0xff] }
 0x2cb   :  { %v2621_v25 = vpack.c.bf16 %v1648_v7, %v1647_v48  ;;  %1818 = vst.msk [vmem:[%s4627_s3 + $0x30] sm:$0xff] %vm4121_vm6, %v2620_v45  ;;  %v703_v14 = vmul.f32 %v3032_v60, %v4783_v40  ;;  %v702_v38 = vmul.f32 %v3032_v60, %v4784_v30  ;;  %v2618_v17 = vpack.c.bf16 %v1642_v44, %v1641_v39  ;;  %v1103_v12 = vld [vmem:[#allocation4 + $0x158] sm:$0x3]  ;;  %v788_v40 = vld [vmem:[#allocation2 + $0x120] sm:$0xff] }
 0x2cc   :  { %v694_v26 = vmul.f32 %v3034_v0, %v4785_v5  ;;  %v693_v20 = vmul.f32 %v3034_v0, %v4786_v37  ;;  %2042 = vmatprep.subr.bf16.mxu1 %v4250_v23  ;;  %v1596_v19 = vmin.f32 %v1552_v46, 1.0  ;;  %v1593_v32 = vmin.f32 %v1549_v36, 1.0  ;;  %v685_v48 = vpop.xlane.xlu1 %684  ;;  %v785_v5 = vld [vmem:[#allocation2 + $0x108] sm:$0xff] }
 0x2cd   :  { %1819 = vst.msk [vmem:[%s4627_s3 + $0x38] sm:$0xff] %vm4121_vm6, %v2621_v25  ;;  %v1644_v52 = vmul.f32 %v4101_v43, %v703_v14  ;;  %v1595_v58 = vmin.f32 %v1551_v49, 1.0  ;;  %v3036_v15 = vpop.eup %3035  ;;  %3039 = vrcp.f32 %v600_v41  ;;  %v1643_v55 = vmul.f32 %v4199_v35, %v702_v38  ;;  %1816 = vst.msk [vmem:[%s4627_s3 + $0x20] sm:$0xff] %vm4121_vm6, %v2618_v17  ;;  %v790_v14 = vld [vmem:[#allocation2 + $0x130] sm:$0xff] }
 0x2ce   :  { %2043 = vmatpush1.bf16.msra.mxu1 %v4252_v57  ;;  %v1638_v4 = vmul.f32 %v1594_v54, %v694_v26  ;;  %v1328_v29 = vadd.f32 1.0, %v4150_v28  ;;  %v697_v18 = vmul.f32 %v3036_v15, %v4787_v6  ;;  %v696_v33 = vmul.f32 %v3036_v15, %v4788_v56  ;;  %v791_v54 = vld [vmem:[#allocation2 + $0x138] sm:$0xff]  ;;  %v4791_v6 = vld [vmem:[#allocation21_spill] sm:$0xff] }
 0x2cf   :  { %v3038_v43 = vpop.eup %3037  ;;  %v4278_v46 = vpack.c.bf16 %v1644_v52, %v1642_v44  ;;  %v1637_v24 = vmul.f32 %v1593_v32, %v693_v20  ;;  %v4282_v34 = vpack.c.bf16 %v1643_v55, %v1641_v39  ;;  %v2619_v35 = vpack.c.bf16 %v1644_v52, %v1643_v55  ;;  %v789_v39 = vld [vmem:[#allocation2 + $0x128] sm:$0xff]  ;;  %v4790_v15 = vld [vmem:[#allocation19_spill] sm:$0xff] }
 0x2d0   :  { %3041 = vrcp.f32 %v1328_v29  ;;  %v1147_v9 = vadd.f32 %v1103_v12, %v1059_v59  ;;  %v1640_v28 = vmul.f32 %v1596_v19, %v697_v18  ;;  %v1639_v8 = vmul.f32 %v1595_v58, %v696_v33 }
 0x2d1   :  { %3043 = vrcp.f32 %v604_v27  ;;  %2044 = vmatprep.subr.bf16.mxu1 %v4278_v46  ;;  %v2616_v7 = vpack.c.bf16 %v1638_v4, %v1637_v24  ;;  %1817 = vst.msk [vmem:[%s4627_s3 + $0x28] sm:$0xff] %vm4121_vm6, %v2619_v35  ;;  %v1325_v1 = vadd.f32 1.0, %v4207_v21  ;;  %v924_v59 = vsub.f32 1.0, %v4789_v22  ;;  %v787_v35 = vld [vmem:[#allocation2 + $0x118] sm:$0xff] }
 0x2d2   :  { %2045 = vmatpush1.bf16.msra.mxu1 %v4282_v34  ;;  %3045 = vpow2.f32 %v4107_v63  ;;  %v4297_v45 = vpack.c.bf16 %v1640_v28, %v1638_v4  ;;  %v4299_v36 = vpack.c.bf16 %v1639_v8, %v1637_v24  ;;  %v2617_v60 = vpack.c.bf16 %v1640_v28, %v1639_v8 }
 0x2d3   :  { %3047 = vrcp.f32 %v680_v3  ;;  %1814 = vst.msk [vmem:[%s4627_s3 + $0x10] sm:$0xff] %vm4121_vm6, %v2616_v7  ;;  %v926_v41 = vsub.f32 1.0, %v4093_v2  ;;  %v1458_v63 = vmul.f32 1.2, %v3038_v43  ;;  %v2513_v21 = vmul.f32 -1.5, %v1147_v9 }
 0x2d4   :  { %3049 = vrcp.f32 %v1325_v1  ;;  %2046 = vmatprep.subr.bf16.mxu1 %v4297_v45  ;;  %1815 = vst.msk [vmem:[%s4627_s3 + $0x18] sm:$0xff] %vm4121_vm6, %v2617_v60  ;;  %v1319_v44 = vmul.f32 1.442695, %v4140_v31  ;;  %v921_v49 = vsub.f32 1.0, %v789_v39  ;;  %v923_v25 = vsub.f32 1.0, %v791_v54  ;;  %v4792_v1 = vld [vmem:[#allocation18_spill] sm:$0xff] }
 0x2d5   :  { %3051 = vrcp.f32 %v685_v48  ;;  %v1323_v2 = vmul.f32 1.442695, %v2513_v21  ;;  %v1502_v0 = vadd.f32 -0.1, %v1458_v63  ;;  %v920_v30 = vsub.f32 1.0, %v788_v40  ;;  %v1100_v60 = vld [vmem:[#allocation4 + $0x140] sm:$0xff] }
 0x2d6   :  { %2047 = vmatpush1.bf16.msra.mxu1 %v4299_v36  ;;  %3053 = vlog2.f32 %v924_v59  ;;  %v922_v17 = vsub.f32 1.0, %v790_v14  ;;  %v917_v58 = vsub.f32 1.0, %v785_v5  ;;  %v877_v29 = vmul.f32 0.6931472, %v4129_v50 }
 0x2d7   :  { %3055 = vpow2.f32 %v1319_v44  ;;  %v1546_v38 = vmax.f32 %v1502_v0, 0.0  ;;  %v881_v3 = vmul.f32 0.6931472, %v4179_v13 }
 0x2d8   :  { %3057 = vlog2.f32 %v926_v41 }
 0x2d9   :  { %3059 = vpow2.f32 %v1323_v2  ;;  %v1590_v4 = vmin.f32 %v1546_v38, 1.0  ;;  %v1102_v2 = vld [vmem:[#allocation4 + $0x150] sm:$0x3] }
 0x2da   :  { %3061 = vlog2.f32 %v789_v39  ;;  %v3040_v27 = vpop.eup %3039 }
 0x2db   :  { %3063 = vlog2.f32 %v791_v54  ;;  %v688_v55 = vmul.f32 %v3040_v27, %v4790_v15  ;;  %v687_v22 = vmul.f32 %v3040_v27, %v4792_v1  ;;  %v1097_v15 = vld [vmem:[#allocation4 + $0x128] sm:$0xff] }
 0x2dc   :  { %3065 = vlog2.f32 %v921_v49  ;;  %v919_v49 = vsub.f32 1.0, %v787_v35 }
 0x2dd   :  { %v3042_v31 = vpop.eup %3041  ;;  %3067 = vlog2.f32 %v923_v25  ;;  %v1634_v48 = vmul.f32 %v1590_v4, %v688_v55 }
 0x2de   :  { %v4315_v26 = vpop.eup %3043  ;;  %v1460_v37 = vmul.f32 1.2, %v3042_v31  ;;  %3069 = vlog2.f32 %v788_v40 }
 0x2df   :  { %v3046_v20 = vpop.eup %3045  ;;  %3071 = vlog2.f32 %v790_v14  ;;  %v691_v18 = vmul.f32 %v4315_v26, %v4791_v6 }
 0x2e0   :  { %v4317_v52 = vpop.eup %3047  ;;  %v1504_v19 = vadd.f32 -0.1, %v1460_v37  ;;  %v1327_v32 = vadd.f32 1.0, %v3046_v20  ;;  %3073 = vlog2.f32 %v920_v30  ;;  %v784_v30 = vld [vmem:[#allocation2 + $0x100] sm:$0xff] }
 0x2e1   :  { %v3050_v12 = vpop.eup %3049  ;;  %3075 = vlog2.f32 %v922_v17  ;;  %v916_v55 = vsub.f32 1.0, %v784_v30 }
 0x2e2   :  { %v4321_v43 = vpop.eup %3051  ;;  %v1548_v56 = vmax.f32 %v1504_v19, 0.0  ;;  %3077 = vrcp.f32 %v1327_v32  ;;  %v1457_v33 = vmul.f32 1.2, %v3050_v12 }
 0x2e3   :  { %v3054_v24 = vpop.eup %3053  ;;  %3079 = vlog2.f32 %v785_v5 }
 0x2e4   :  { %v3056_v9 = vpop.eup %3055  ;;  %v1592_v28 = vmin.f32 %v1548_v56, 1.0  ;;  %v1501_v8 = vadd.f32 -0.1, %v1457_v33  ;;  %v1009_v7 = vmul.f32 0.6931472, %v3054_v24  ;;  %3081 = vlog2.f32 %v787_v35  ;;  %v1099_v33 = vld [vmem:[#allocation4 + $0x138] sm:$0xff] }
 0x2e5   :  { %v3058_v50 = vpop.eup %3057  ;;  %v1366_v59 = vadd.f32 1.0, %v3056_v9  ;;  %3083 = vlog2.f32 %v917_v58  ;;  %v786_v24 = vld [vmem:[#allocation2 + $0x110] sm:$0xff] }
 0x2e6   :  { %v3060_v41 = vpop.eup %3059  ;;  %v4327_v63 = vmul.f32 %v1592_v28, %v691_v18  ;;  %v1545_v21 = vmax.f32 %v1501_v8, 0.0  ;;  %v1013_v44 = vmul.f32 0.6931472, %v3058_v50  ;;  %v1056_v13 = vsub.f32 %v877_v29, %v1009_v7 }
 0x2e7   :  { %v3062_v39 = vpop.eup %3061  ;;  %v1368_v54 = vadd.f32 1.0, %v3060_v41  ;;  %3085 = vrcp.f32 %v1366_v59  ;;  %v918_v41 = vsub.f32 1.0, %v786_v24 }
 0x2e8   :  { %v3064_v0 = vpop.eup %3063  ;;  %v1678_v25 = vpack.c.bf16 %v4327_v63, %v1634_v48  ;;  %v1589_v40 = vmin.f32 %v1545_v21, 1.0  ;;  %v1058_v14 = vsub.f32 %v881_v3, %v1013_v44  ;;  %v1144_v27 = vadd.f32 %v1100_v60, %v1056_v13  ;;  %v1096_v60 = vld [vmem:[#allocation4 + $0x120] sm:$0xff] }
 0x2e9   :  { %v3066_v31 = vpop.eup %3065  ;;  %3087 = vrcp.f32 %v1368_v54  ;;  %v871_v38 = vmul.f32 0.6931472, %v3062_v39  ;;  %v875_v17 = vmul.f32 0.6931472, %v3064_v0  ;;  %v1098_v54 = vld [vmem:[#allocation4 + $0x130] sm:$0xff] }
 0x2ea   :  { %v3068_v5 = vpop.eup %3067  ;;  %2048 = vmatprep.subr.bf16.mxu1 %v1678_v25  ;;  %2559 = vmatprep.mubr.msk.bf16.mxu1 %vm373_vm1, %v1678_v25  ;;  %v4331_v37 = vmul.f32 %v1589_v40, %v687_v22  ;;  %v1146_v20 = vadd.f32 %v1102_v2, %v1058_v14  ;;  %v2510_v19 = vmul.f32 -1.5, %v1144_v27  ;;  %v1003_v32 = vmul.f32 0.6931472, %v3066_v31 }
 0x2eb   :  { %v3070_v58 = vpop.eup %3069  ;;  %v1007_v12 = vmul.f32 0.6931472, %v3068_v5  ;;  %3089 = vlog2.f32 %v919_v49 }
 0x2ec   :  { %v3072_v4 = vpop.eup %3071  ;;  %v2614_v29 = vpack.c.bf16 %v1634_v48, %v4331_v37  ;;  %v2512_v6 = vmul.f32 -1.5, %v1146_v20  ;;  %v1317_v18 = vmul.f32 1.442695, %v2510_v19  ;;  %v1053_v56 = vsub.f32 %v871_v38, %v1003_v32  ;;  %v4793_v20 = vld [vmem:[#allocation20_spill] sm:$0xff] }
 0x2ed   :  { %v3074_v3 = vpop.eup %3073  ;;  %v1055_v35 = vsub.f32 %v875_v17, %v1007_v12  ;;  %v869_v9 = vmul.f32 0.6931472, %v3070_v58  ;;  %v873_v28 = vmul.f32 0.6931472, %v3072_v4  ;;  %3091 = vlog2.f32 %v784_v30  ;;  %v1093_v12 = vld [vmem:[#allocation4 + $0x108] sm:$0xff] }
 0x2ee   :  { %v3076_v8 = vpop.eup %3075  ;;  %1812 = vst.msk [vmem:[%s4627_s3] sm:$0xff] %vm4121_vm6, %v2614_v29  ;;  %3093 = vpow2.f32 %v1317_v18  ;;  %v1321_v7 = vmul.f32 1.442695, %v2512_v6  ;;  %v1141_v50 = vadd.f32 %v1097_v15, %v1053_v56  ;;  %v1001_v48 = vmul.f32 0.6931472, %v3074_v3 }
 0x2ef   :  { %v3078_v1 = vpop.eup %3077  ;;  %v1143_v22 = vadd.f32 %v1099_v33, %v1055_v35  ;;  %v1005_v59 = vmul.f32 0.6931472, %v3076_v8  ;;  %3095 = vlog2.f32 %v786_v24  ;;  %v690_v19 = vmul.f32 %v4315_v26, %v4793_v20 }
 0x2f0   :  { %v3080_v21 = vpop.eup %3079  ;;  %v1459_v44 = vmul.f32 1.2, %v3078_v1  ;;  %3097 = vpow2.f32 %v1321_v7  ;;  %v2507_v13 = vmul.f32 -1.5, %v1141_v50  ;;  %v1052_v39 = vsub.f32 %v869_v9, %v1001_v48 }
 0x2f1   :  { %v3082_v2 = vpop.eup %3081  ;;  %v2509_v49 = vmul.f32 -1.5, %v1143_v22  ;;  %v1054_v0 = vsub.f32 %v873_v28, %v1005_v59  ;;  %v863_v25 = vmul.f32 0.6931472, %v3080_v21  ;;  %3099 = vlog2.f32 %v916_v55  ;;  %v4794_v22 = vld [vmem:[#allocation23_spill] sm:$0xff] }
 0x2f2   :  { %v3084_v40 = vpop.eup %3083  ;;  %v1503_v14 = vadd.f32 -0.1, %v1459_v44  ;;  %v1311_v27 = vmul.f32 1.442695, %v2507_v13  ;;  %v1140_v30 = vadd.f32 %v1096_v60, %v1052_v39  ;;  %3101 = vlog2.f32 %v918_v41  ;;  %v1095_v60 = vld [vmem:[#allocation4 + $0x118] sm:$0xff]  ;;  %v4795_v44 = vld [vmem:[#allocation25_spill] sm:$0xff] }
 0x2f3   :  { %v1315_v31 = vmul.f32 1.442695, %v2509_v49  ;;  %v1142_v38 = vadd.f32 %v1098_v54, %v1054_v0  ;;  %v995_v17 = vmul.f32 0.6931472, %v3084_v40  ;;  %v867_v56 = vmul.f32 0.6931472, %v3082_v2 }
 0x2f4   :  { %v3086_v5 = vpop.eup %3085  ;;  %v1547_v32 = vmax.f32 %v1503_v14, 0.0  ;;  %3103 = vpow2.f32 %v1311_v27  ;;  %v2506_v58 = vmul.f32 -1.5, %v1140_v30  ;;  %v748_v59 = vmul.f32 %v4317_v52, %v4794_v22 }
 0x2f5   :  { %v1498_v15 = vmul.f32 1.2, %v3086_v5  ;;  %3105 = vpow2.f32 %v1315_v31  ;;  %v2508_v4 = vmul.f32 -1.5, %v1142_v38  ;;  %v1049_v55 = vsub.f32 %v863_v25, %v995_v17 }
 0x2f6   :  { %v3088_v29 = vpop.eup %3087  ;;  %v1591_v6 = vmin.f32 %v1547_v32, 1.0  ;;  %v1309_v18 = vmul.f32 1.442695, %v2506_v58  ;;  %v751_v13 = vmul.f32 %v4321_v43, %v4795_v44  ;;  %v1092_v32 = vld [vmem:[#allocation4 + $0x100] sm:$0xff] }
 0x2f7   :  { %v1500_v33 = vmul.f32 1.2, %v3088_v29  ;;  %v1542_v24 = vadd.f32 -0.1, %v1498_v15  ;;  %v1313_v3 = vmul.f32 1.442695, %v2508_v4  ;;  %v1137_v35 = vadd.f32 %v1093_v12, %v1049_v55 }
 0x2f8   :  { %v3090_v9 = vpop.eup %3089  ;;  %v1635_v28 = vmul.f32 %v1591_v6, %v690_v19  ;;  %3107 = vpow2.f32 %v1309_v18  ;;  %v1094_v18 = vld [vmem:[#allocation4 + $0x110] sm:$0xff] }
 0x2f9   :  { %v1544_v26 = vadd.f32 -0.1, %v1500_v33  ;;  %v1586_v8 = vmax.f32 %v1542_v24, 0.0  ;;  %3109 = vpow2.f32 %v1313_v3  ;;  %v999_v7 = vmul.f32 0.6931472, %v3090_v9 }
 0x2fa   :  { %v3092_v50 = vpop.eup %3091  ;;  %v4342_v48 = vpack.c.bf16 %v1635_v28, %v4331_v37  ;;  %v2615_v1 = vpack.c.bf16 %v4327_v63, %v1635_v28  ;;  %v2503_v41 = vmul.f32 -1.5, %v1137_v35  ;;  %v676_v35 = vpop.xlane.xlu1 %675 }
 0x2fb   :  { %v3094_v21 = vpop.eup %3093  ;;  %v1588_v39 = vmax.f32 %v1544_v26, 0.0  ;;  %v1630_v54 = vmin.f32 %v1586_v8, 1.0  ;;  %v1051_v2 = vsub.f32 %v867_v56, %v999_v7  ;;  %v861_v14 = vmul.f32 0.6931472, %v3092_v50  ;;  %v672_v56 = vpop.xlane.xlu0 %671 }
 0x2fc   :  { %v3096_v49 = vpop.eup %3095  ;;  %1813 = vst.msk [vmem:[%s4627_s3 + $0x8] sm:$0xff] %vm4121_vm6, %v2615_v1  ;;  %2049 = vmatpush1.bf16.msra.mxu1 %v4342_v48  ;;  %v1365_v63 = vadd.f32 1.0, %v3094_v21  ;;  %v1303_v37 = vmul.f32 1.442695, %v2503_v41 }
 0x2fd   :  { %v3098_v0 = vpop.eup %3097  ;;  %v1632_v25 = vmin.f32 %v1588_v39, 1.0  ;;  %v1139_v40 = vadd.f32 %v1095_v60, %v1051_v2  ;;  %v4355_v30 = vmul.f32 %v1630_v54, %v748_v59  ;;  %v865_v38 = vmul.f32 0.6931472, %v3096_v49 }
 0x2fe   :  { %v3100_v27 = vpop.eup %3099  ;;  %v1367_v31 = vadd.f32 1.0, %v3098_v0  ;;  %3111 = vrcp.f32 %v1365_v63  ;;  %v4796_v63 = vld [vmem:[#allocation22_spill] sm:$0xff] }
 0x2ff   :  { %v4357_v17 = vmul.f32 %v1632_v25, %v751_v13  ;;  %v2505_v5 = vmul.f32 -1.5, %v1139_v40  ;;  %3113 = vpow2.f32 %v1303_v37  ;;  %v993_v20 = vmul.f32 0.6931472, %v3100_v27  ;;  %v3102_v19 = vpop.eup %3101  ;;  %v664_v39 = vpop.xlane.xlu0 %663 }
 0x300   :  { %3115 = vrcp.f32 %v1367_v31  ;;  %v997_v4 = vmul.f32 0.6931472, %v3102_v19  ;;  %v747_v37 = vmul.f32 %v4317_v52, %v4796_v63  ;;  %v668_v31 = vpop.xlane.xlu1 %667  ;;  %v4803_v63 = vld [vmem:[#allocation31_spill] sm:$0xff] }
 0x301   :  { %v3104_v58 = vpop.eup %3103  ;;  %v4361_v12 = vpack.c.bf16 %v4357_v17, %v4355_v30  ;;  %v1307_v15 = vmul.f32 1.442695, %v2505_v5  ;;  %v1048_v55 = vsub.f32 %v861_v14, %v993_v20 }
 0x302   :  { %v3106_v29 = vpop.eup %3105  ;;  %v1362_v6 = vadd.f32 1.0, %v3104_v58  ;;  %v1050_v24 = vsub.f32 %v865_v38, %v997_v4  ;;  %v4797_v38 = vld [vmem:[#allocation24_spill] sm:$0xff] }
 0x303   :  { %2558 = vmatprep.subr.msk.bf16.mxu1 %vm2028_vm7, %v4361_v12  ;;  %v1364_v33 = vadd.f32 1.0, %v3106_v29  ;;  %3117 = vpow2.f32 %v1307_v15  ;;  %v1136_v3 = vadd.f32 %v1092_v32, %v1048_v55  ;;  %v750_v5 = vmul.f32 %v4321_v43, %v4797_v38 }
 0x304   :  { %3119 = vrcp.f32 %v1362_v6  ;;  %v1138_v28 = vadd.f32 %v1094_v18, %v1050_v24 }
 0x305   :  { %v3108_v9 = vpop.eup %3107  ;;  %3121 = vrcp.f32 %v1364_v33  ;;  %v2502_v26 = vmul.f32 -1.5, %v1136_v3 }
 0x306   :  { %v3110_v8 = vpop.eup %3109  ;;  %3123 = vrcp.f32 %v672_v56  ;;  %v1361_v7 = vadd.f32 1.0, %v3108_v9  ;;  %v2504_v1 = vmul.f32 -1.5, %v1138_v28  ;;  %v4798_v9 = vld [vmem:[#allocation27_spill] sm:$0xff] }
 0x307   :  { %3125 = vrcp.f32 %v676_v35  ;;  %v1363_v50 = vadd.f32 1.0, %v3110_v8  ;;  %v1301_v22 = vmul.f32 1.442695, %v2502_v26  ;;  %v4799_v26 = vld [vmem:[#allocation28_spill] sm:$0xff] }
 0x308   :  { %3127 = vrcp.f32 %v1361_v7  ;;  %v1305_v59 = vmul.f32 1.442695, %v2504_v1 }
 0x309   :  { %3129 = vrcp.f32 %v1363_v50 }
 0x30a   :  { %3131 = vpow2.f32 %v1301_v22 }
 0x30b   :  { %v3112_v60 = vpop.eup %3111  ;;  %3133 = vpow2.f32 %v1305_v59 }
 0x30c   :  { %v3114_v41 = vpop.eup %3113  ;;  %v1497_v21 = vmul.f32 1.2, %v3112_v60 }
 0x30d   :  { %v3116_v44 = vpop.eup %3115  ;;  %v1358_v13 = vadd.f32 1.0, %v3114_v41 }
 0x30e   :  { %v1499_v54 = vmul.f32 1.2, %v3116_v44  ;;  %v1541_v2 = vadd.f32 -0.1, %v1497_v21 }
 0x30f   :  { %3135 = vrcp.f32 %v1358_v13 }
 0x310   :  { %v3118_v49 = vpop.eup %3117  ;;  %v1543_v0 = vadd.f32 -0.1, %v1499_v54  ;;  %v1585_v25 = vmax.f32 %v1541_v2, 0.0  ;;  %3137 = vrcp.f32 %v664_v39  ;;  %v4802_v2 = vld [vmem:[#allocation26_spill] sm:$0xff] }
 0x311   :  { %v3120_v40 = vpop.eup %3119  ;;  %v1360_v14 = vadd.f32 1.0, %v3118_v49 }
 0x312   :  { %v3122_v27 = vpop.eup %3121  ;;  %v1587_v20 = vmax.f32 %v1543_v0, 0.0  ;;  %v1629_v19 = vmin.f32 %v1585_v25, 1.0  ;;  %v1494_v32 = vmul.f32 1.2, %v3120_v40 }
 0x313   :  { %v3124_v58 = vpop.eup %3123  ;;  %v1496_v15 = vmul.f32 1.2, %v3122_v27  ;;  %3139 = vrcp.f32 %v1360_v14 }
 0x314   :  { %v3126_v4 = vpop.eup %3125  ;;  %v1631_v55 = vmin.f32 %v1587_v20, 1.0  ;;  %v1673_v52 = vmul.f32 %v1629_v19, %v747_v37  ;;  %v1538_v29 = vadd.f32 -0.1, %v1494_v32  ;;  %3141 = vrcp.f32 %v668_v31 }
 0x315   :  { %v3128_v6 = vpop.eup %3127  ;;  %v1540_v18 = vadd.f32 -0.1, %v1496_v15  ;;  %v742_v28 = vmul.f32 %v3124_v58, %v4798_v9  ;;  %v745_v8 = vmul.f32 %v3126_v4, %v4799_v26  ;;  %v741_v49 = vmul.f32 %v3124_v58, %v4802_v2 }
 0x316   :  { %v3130_v56 = vpop.eup %3129  ;;  %v1675_v33 = vmul.f32 %v1631_v55, %v750_v5  ;;  %v2634_v24 = vpack.c.bf16 %v4355_v30, %v1673_v52  ;;  %v1582_v43 = vmax.f32 %v1538_v29, 0.0  ;;  %v1493_v3 = vmul.f32 1.2, %v3128_v6 }
 0x317   :  { %v3132_v35 = vpop.eup %3131  ;;  %v1584_v7 = vmax.f32 %v1540_v18, 0.0  ;;  %v1495_v50 = vmul.f32 1.2, %v3130_v56  ;;  %v744_v37 = vmul.f32 %v3126_v4, %v4803_v63 }
 0x318   :  { %v3134_v22 = vpop.eup %3133  ;;  %v4377_v59 = vpack.c.bf16 %v1675_v33, %v1673_v52  ;;  %v2635_v60 = vpack.c.bf16 %v4357_v17, %v1675_v33  ;;  %1832 = vst.msk [vmem:[%s4627_s3 + $0xa0] sm:$0xff] %vm4121_vm6, %v2634_v24  ;;  %v1626_v30 = vmin.f32 %v1582_v43, 1.0  ;;  %v1537_v41 = vadd.f32 -0.1, %v1493_v3  ;;  %v4804_v33 = vld [vmem:[#allocation30_spill] sm:$0xff]  ;;  %v4805_v43 = vld [vmem:[#allocation32_spill] sm:$0xff] }
 0x319   :  { %v1628_v21 = vmin.f32 %v1584_v7, 1.0  ;;  %v1539_v44 = vadd.f32 -0.1, %v1495_v50  ;;  %v1357_v13 = vadd.f32 1.0, %v3132_v35  ;;  %v1359_v39 = vadd.f32 1.0, %v3134_v22 }
 0x31a   :  { %v2030_v54 = vsel %vm2028_vm7, %v4377_v59, 0  ;;  %v1581_v17 = vmax.f32 %v1537_v41, 0.0  ;;  %1836 = vst.msk [vmem:[%s4627_s3 + $0xa8] sm:$0x11] %vm4373_vm10, %v2635_v60  ;;  %v1670_v0 = vmul.f32 %v1626_v30, %v742_v28 }
 0x31b   :  { %2061 = vmatpush2.bf16.msra.mxu1 %v2030_v54  ;;  %v1672_v25 = vmul.f32 %v1628_v21, %v745_v8  ;;  %v1583_v40 = vmax.f32 %v1539_v44, 0.0  ;;  %3143 = vrcp.f32 %v1357_v13  ;;  %v4806_v44 = vld [vmem:[#allocation29_spill] sm:$0xff] }
 0x31c   :  { %v3136_v14 = vpop.eup %3135  ;;  %v1625_v27 = vmin.f32 %v1581_v17, 1.0  ;;  %3145 = vrcp.f32 %v1359_v39  ;;  %v4807_v54 = vld [vmem:[#allocation33_spill] sm:$0xff] }
 0x31d   :  { %v4394_v31 = vpack.c.bf16 %v1672_v25, %v1670_v0  ;;  %v1627_v38 = vmin.f32 %v1583_v40, 1.0  ;;  %v1490_v5 = vmul.f32 1.2, %v3136_v14  ;;  %v3138_v20 = vpop.eup %3137 }
 0x31e   :  { %v1669_v19 = vmul.f32 %v1625_v27, %v741_v49  ;;  %v736_v24 = vmul.f32 %v3138_v20, %v4804_v33  ;;  %v735_v13 = vmul.f32 %v3138_v20, %v4806_v44 }
 0x31f   :  { %2062 = vmatprep.subr.bf16.mxu1 %v4394_v31  ;;  %v1671_v32 = vmul.f32 %v1627_v38, %v744_v37  ;;  %v1534_v58 = vadd.f32 -0.1, %v1490_v5 }
 0x320   :  { %v3140_v15 = vpop.eup %3139  ;;  %v2632_v4 = vpack.c.bf16 %v1670_v0, %v1669_v19 }
 0x321   :  { %v1695_v55 = vpack.c.bf16 %v1671_v32, %v1669_v19  ;;  %v2633_v52 = vpack.c.bf16 %v1672_v25, %v1671_v32  ;;  %v1492_v29 = vmul.f32 1.2, %v3140_v15  ;;  %v1578_v6 = vmax.f32 %v1534_v58, 0.0  ;;  %v3142_v18 = vpop.eup %3141 }
 0x322   :  { %1830 = vst.msk [vmem:[%s4627_s3 + $0x90] sm:$0xff] %vm4121_vm6, %v2632_v4  ;;  %v739_v3 = vmul.f32 %v3142_v18, %v4805_v43  ;;  %v738_v2 = vmul.f32 %v3142_v18, %v4807_v54 }
 0x323   :  { %1831 = vst.msk [vmem:[%s4627_s3 + $0x98] sm:$0xff] %vm4121_vm6, %v2633_v52  ;;  %2063 = vmatpush2.bf16.msra.mxu1 %v1695_v55  ;;  %v1536_v56 = vadd.f32 -0.1, %v1492_v29  ;;  %v1622_v9 = vmin.f32 %v1578_v6, 1.0 }
 0x325   :  { %v1580_v35 = vmax.f32 %v1536_v56, 0.0  ;;  %v1666_v7 = vmul.f32 %v1622_v9, %v736_v24 }
 0x327   :  { %v1624_v28 = vmin.f32 %v1580_v35, 1.0 }
 0x328   :  { %v3144_v26 = vpop.eup %3143 }
 0x329   :  { %v3146_v8 = vpop.eup %3145  ;;  %v1668_v50 = vmul.f32 %v1624_v28, %v739_v3  ;;  %v1489_v22 = vmul.f32 1.2, %v3144_v26 }
 0x32a   :  { %v1491_v60 = vmul.f32 1.2, %v3146_v8 }
 0x32b   :  { %v1694_v30 = vpack.c.bf16 %v1668_v50, %v1666_v7  ;;  %v1533_v41 = vadd.f32 -0.1, %v1489_v22 }
 0x32c   :  { %v1535_v21 = vadd.f32 -0.1, %v1491_v60 }
 0x32d   :  { %2064 = vmatprep.subr.bf16.mxu1 %v1694_v30  ;;  %v1577_v39 = vmax.f32 %v1533_v41, 0.0 }
 0x32e   :  { %v1579_v49 = vmax.f32 %v1535_v21, 0.0 }
 0x32f   :  { %v1621_v63 = vmin.f32 %v1577_v39, 1.0 }
 0x330   :  { %v1623_v37 = vmin.f32 %v1579_v49, 1.0 }
 0x331   :  { %v1665_v17 = vmul.f32 %v1621_v63, %v735_v13 }
 0x332   :  { %v1667_v0 = vmul.f32 %v1623_v37, %v738_v2 }
 0x333   :  { %v2630_v25 = vpack.c.bf16 %v1666_v7, %v1665_v17 }
 0x334   :  { %v1693_v40 = vpack.c.bf16 %v1667_v0, %v1665_v17  ;;  %v2631_v14 = vpack.c.bf16 %v1668_v50, %v1667_v0 }
 0x335   :  { %1828 = vst.msk [vmem:[%s4627_s3 + $0x80] sm:$0xff] %vm4121_vm6, %v2630_v25 }
 0x336   :  { %1829 = vst.msk [vmem:[%s4627_s3 + $0x88] sm:$0xff] %vm4121_vm6, %v2631_v14  ;;  %2065 = vmatpush2.bf16.msra.mxu1 %v1693_v40 }
 0x339   :  { %2067 = vmatmul.mubr.bf16.vlgmr.msra.gmra.mxu1 %v4342_v48 }
 0x33a   :  { %2560 = vmatprep.mubr.msk.bf16.mxu1 %vm373_vm1, %v4297_v45 }
 0x341   :  { %2077 = vmatmul.mubr.bf16.gmra.mxu1 %v4299_v36 }
 0x342   :  { %2561 = vmatprep.mubr.msk.bf16.mxu1 %vm373_vm1, %v4278_v46 }
 0x349   :  { %2087 = vmatmul.mubr.bf16.gmra.mxu1 %v4282_v34 }
 0x34a   :  { %2562 = vmatprep.mubr.msk.bf16.mxu1 %vm373_vm1, %v4250_v23 }
 0x351   :  { %2097 = vmatmul.mubr.bf16.gmra.mxu1 %v4252_v57 }
 0x352   :  { %2563 = vmatprep.mubr.msk.bf16.mxu1 %vm373_vm1, %v4225_v53 }
 0x359   :  { %2107 = vmatmul.mubr.bf16.gmra.mxu1 %v4230_v16 }
 0x35a   :  { %2564 = vmatprep.mubr.msk.bf16.mxu1 %vm373_vm1, %v4202_v11 }
 0x361   :  { %2117 = vmatmul.mubr.bf16.gmra.mxu1 %v4204_v47 }
 0x362   :  { %2565 = vmatprep.mubr.msk.bf16.mxu1 %vm373_vm1, %v4172_v61  ;;  %v1837_v61 = vlaneseq }
 0x364   :  { %v4449_v11 = vshrl.u32 %v1837_v61, 7 }
 0x366   :  { %v1840_v23 = vadd.s32 16, %v4449_v11  ;;  %v1842_v58 = vadd.s32 32, %v4449_v11  ;;  %v1843_v56 = vadd.s32 40, %v4449_v11  ;;  %v1844_v26 = vadd.s32 48, %v4449_v11 }
 0x367   :  { %v1845_v21 = vadd.s32 56, %v4449_v11  ;;  %v1846_v37 = vadd.s32 64, %v4449_v11 }
 0x369   :  { %2127 = vmatmul.mubr.bf16.gmra.mxu1 %v4176_v42  ;;  %v4451_v42 = vand.u32 127, %v1837_v61 }
 0x36a   :  { %2566 = vmatprep.mubr.msk.bf16.mxu1 %vm373_vm1, %v4142_v51  ;;  %v1839_v51 = vadd.s32 8, %v4449_v11 }
 0x36b   :  { %vm1863_vm11 = vcmp.eq.s32.totalorder %v4449_v11, %v4451_v42  ;;  %vm1867_vm13 = vcmp.eq.s32.totalorder %v1840_v23, %v4451_v42  ;;  %vm1871_vm15 = vcmp.eq.s32.totalorder %v1842_v58, %v4451_v42  ;;  %vm1873_vm0 = vcmp.eq.s32.totalorder %v1843_v56, %v4451_v42 }
 0x36c   :  { %vm1865_vm12 = vcmp.eq.s32.totalorder %v1839_v51, %v4451_v42  ;;  %vm1877_vm2 = vcmp.eq.s32.totalorder %v1845_v21, %v4451_v42  ;;  %vm1879_vm3 = vcmp.eq.s32.totalorder %v1846_v37, %v4451_v42 }
 0x371   :  { %2137 = vmatmul.mubr.bf16.gmra.mxu1 %v4144_v10  ;;  %v4808_v10 = vmov 0.0  }
 0x372   :  { %2567 = vmatprep.mubr.msk.bf16.mxu1 %vm373_vm1, %v1694_v30  ;;  %v2536_v47 = vsel %vm1863_vm11, 1.0, %v4808_v10  ;;  %v2537_v45 = vsel %vm1865_vm12, 1.0, %v4808_v10  ;;  %v2538_v5 = vsel %vm1867_vm13, 1.0, %v4808_v10  ;;  %v2540_v3 = vsel %vm1871_vm15, 1.0, %v4808_v10 }
 0x373   :  { %v2541_v22 = vsel %vm1873_vm0, 1.0, %v4808_v10 }
 0x379   :  { %2147 = vmatmul.mubr.bf16.gmra.mxu1 %v1693_v40  ;;  %v2543_v40 = vsel %vm1877_vm2, 1.0, %v4808_v10 }
 0x37a   :  { %2568 = vmatprep.mubr.msk.bf16.mxu1 %vm373_vm1, %v4394_v31 }
 0x381   :  { %2157 = vmatmul.mubr.bf16.gmra.mxu1 %v1695_v55 }
 0x382   :  { %2569 = vmatprep.mubr.msk.bf16.mxu1 %vm373_vm1, %v4361_v12  ;;  %vm1875_vm1 = vcmp.eq.s32.totalorder %v1844_v26, %v4451_v42 }
 0x383   :  { %v2542_v54 = vsel %vm1875_vm1, 1.0, %v4808_v10 }
 0x389   :  { %2167 = vmatmul.mubr.bf16.gmra.mxu1 %v4377_v59  ;;  %v1841_v59 = vadd.s32 24, %v4449_v11 }
 0x38b   :  { %vm1869_vm14 = vcmp.eq.s32.totalorder %v1841_v59, %v4451_v42 }
 0x38c   :  { %v2539_v52 = vsel %vm1869_vm14, 1.0, %v4808_v10 }
 0x3f9   :  { %v2068_v53 = vpop.f32.mrf.mxu1 }
 0x3fa   :  { %v2177_v16 = vmul.f32 2.0, %v2068_v53 }
 0x3fb   :  { %v2070_v57 = vpop.f32.mrf.mxu1 }
 0x3fc   :  { %v2221_v46 = vsub.f32 %v2177_v16, %v2536_v47  ;;  %v2178_v34 = vmul.f32 2.0, %v2070_v57  ;;  %v1847_v47 = vadd.s32 72, %v4449_v11  ;;  %v2544_v57 = vsel %vm1879_vm3, 1.0, %v4808_v10 }
 0x3fd   :  { %v2072_v36 = vpop.f32.mrf.mxu1 }
 0x3fe   :  { %v2636_v48 = vpack.c.bf16 %v2178_v34, %v2221_v46  ;;  %v2179_v12 = vmul.f32 2.0, %v2072_v36  ;;  %vm1881_vm4 = vcmp.eq.s32.totalorder %v1847_v47, %v4451_v42  ;;  %v1848_v36 = vadd.s32 80, %v4449_v11 }
 0x3ff   :  { %v2074_v27 = vpop.f32.mrf.mxu1  ;;  %v1854_v47 = vadd.s32 128, %v4449_v11 }
 0x400   :  { %2592 = vst.msk [vmem:[%s4627_s3 + $0xb0] sm:$0xff] %vm4121_vm6, %v2636_v48  ;;  %v2223_v31 = vsub.f32 %v2179_v12, %v2537_v45  ;;  %v2180_v38 = vmul.f32 2.0, %v2074_v27  ;;  %v2545_v27 = vsel %vm1881_vm4, 1.0, %v4808_v10  ;;  %vm1883_vm5 = vcmp.eq.s32.totalorder %v1848_v36, %v4451_v42 }
 0x401   :  { %v2078_v20 = vpop.f32.mrf.mxu1 }
 0x402   :  { %v2637_v19 = vpack.c.bf16 %v2180_v38, %v2223_v31  ;;  %v2181_v32 = vmul.f32 2.0, %v2078_v20  ;;  %v1849_v20 = vadd.s32 88, %v4449_v11 }
 0x403   :  { %v2080_v15 = vpop.f32.mrf.mxu1 }
 0x404   :  { %2593 = vst.msk [vmem:[%s4627_s3 + $0xb8] sm:$0xff] %vm4121_vm6, %v2637_v19  ;;  %v2225_v4 = vsub.f32 %v2181_v32, %v2538_v5  ;;  %v2182_v55 = vmul.f32 2.0, %v2080_v15  ;;  %v2546_v15 = vsel %vm1883_vm5, 1.0, %v4808_v10  ;;  %vm1885_vm7 = vcmp.eq.s32.totalorder %v1849_v20, %v4451_v42 }
 0x405   :  { %v2082_v29 = vpop.f32.mrf.mxu1 }
 0x406   :  { %v2638_v6 = vpack.c.bf16 %v2182_v55, %v2225_v4  ;;  %v2183_v18 = vmul.f32 2.0, %v2082_v29  ;;  %v1850_v29 = vadd.s32 96, %v4449_v11 }
 0x407   :  { %v2084_v33 = vpop.f32.mrf.mxu1 }
 0x408   :  { %2594 = vst.msk [vmem:[%s4627_s3 + $0xc0] sm:$0xff] %vm4121_vm6, %v2638_v6  ;;  %v2227_v24 = vsub.f32 %v2183_v18, %v2539_v52  ;;  %v2184_v43 = vmul.f32 2.0, %v2084_v33  ;;  %v2547_v33 = vsel %vm1885_vm7, 1.0, %v4808_v10  ;;  %vm1887_vm8 = vcmp.eq.s32.totalorder %v1850_v29, %v4451_v42 }
 0x409   :  { %v2088_v35 = vpop.f32.mrf.mxu1 }
 0x40a   :  { %v2639_v9 = vpack.c.bf16 %v2184_v43, %v2227_v24  ;;  %v2185_v28 = vmul.f32 2.0, %v2088_v35  ;;  %v1851_v35 = vadd.s32 104, %v4449_v11 }
 0x40b   :  { %v2090_v8 = vpop.f32.mrf.mxu1 }
 0x40c   :  { %2595 = vst.msk [vmem:[%s4627_s3 + $0xc8] sm:$0xff] %vm4121_vm6, %v2639_v9  ;;  %v2229_v7 = vsub.f32 %v2185_v28, %v2540_v3  ;;  %v2186_v50 = vmul.f32 2.0, %v2090_v8  ;;  %v2548_v8 = vsel %vm1887_vm8, 1.0, %v4808_v10  ;;  %vm1889_vm9 = vcmp.eq.s32.totalorder %v1851_v35, %v4451_v42 }
 0x40d   :  { %v2092_v60 = vpop.f32.mrf.mxu1 }
 0x40e   :  { %v2640_v30 = vpack.c.bf16 %v2186_v50, %v2229_v7  ;;  %v2187_v41 = vmul.f32 2.0, %v2092_v60  ;;  %v1852_v60 = vadd.s32 112, %v4449_v11 }
 0x40f   :  { %v2094_v44 = vpop.f32.mrf.mxu1 }
 0x410   :  { %2596 = vst.msk [vmem:[%s4627_s3 + $0xd0] sm:$0xff] %vm4121_vm6, %v2640_v30  ;;  %v2231_v13 = vsub.f32 %v2187_v41, %v2541_v22  ;;  %v2188_v39 = vmul.f32 2.0, %v2094_v44  ;;  %v2549_v44 = vsel %vm1889_vm9, 1.0, %v4808_v10  ;;  %vm1891_vm11 = vcmp.eq.s32.totalorder %v1852_v60, %v4451_v42 }
 0x411   :  { %v2098_v2 = vpop.f32.mrf.mxu1 }
 0x412   :  { %v2641_v49 = vpack.c.bf16 %v2188_v39, %v2231_v13  ;;  %v2189_v63 = vmul.f32 2.0, %v2098_v2  ;;  %v1853_v2 = vadd.s32 120, %v4449_v11 }
 0x413   :  { %v2100_v17 = vpop.f32.mrf.mxu1 }
 0x414   :  { %2597 = vst.msk [vmem:[%s4627_s3 + $0xd8] sm:$0xff] %vm4121_vm6, %v2641_v49  ;;  %v2233_v0 = vsub.f32 %v2189_v63, %v2542_v54  ;;  %v2190_v25 = vmul.f32 2.0, %v2100_v17  ;;  %v2550_v17 = vsel %vm1891_vm11, 1.0, %v4808_v10  ;;  %vm1893_vm12 = vcmp.eq.s32.totalorder %v1853_v2, %v4451_v42 }
 0x415   :  { %v2102_v14 = vpop.f32.mrf.mxu1 }
 0x416   :  { %v2642_v61 = vpack.c.bf16 %v2190_v25, %v2233_v0  ;;  %v2191_v51 = vmul.f32 2.0, %v2102_v14 }
 0x417   :  { %v2104_v53 = vpop.f32.mrf.mxu1 }
 0x418   :  { %2598 = vst.msk [vmem:[%s4627_s3 + $0xe0] sm:$0xff] %vm4121_vm6, %v2642_v61  ;;  %v2235_v16 = vsub.f32 %v2191_v51, %v2543_v40  ;;  %v2192_v23 = vmul.f32 2.0, %v2104_v53  ;;  %v1862_v53 = vadd.s32 128, %v4451_v42 }
 0x419   :  { %v2108_v46 = vpop.f32.mrf.mxu1 }
 0x41a   :  { %v2643_v34 = vpack.c.bf16 %v2192_v23, %v2235_v16  ;;  %v2193_v45 = vmul.f32 2.0, %v2108_v46  ;;  %v2551_v16 = vsel %vm1893_vm12, 1.0, %v4808_v10  ;;  %vm1896_vm13 = vcmp.eq.s32.totalorder %v1854_v47, %v1862_v53 }
 0x41b   :  { %v2110_v48 = vpop.f32.mrf.mxu1  ;;  %v2552_v42 = vsel %vm1896_vm13, 1.0, %v4808_v10 }
 0x41c   :  { %2599 = vst.msk [vmem:[%s4627_s3 + $0xe8] sm:$0xff] %vm4121_vm6, %v2643_v34  ;;  %v2237_v12 = vsub.f32 %v2193_v45, %v2544_v57  ;;  %v2194_v59 = vmul.f32 2.0, %v2110_v48  ;;  %v1855_v48 = vadd.s32 136, %v4449_v11 }
 0x41d   :  { %v2112_v31 = vpop.f32.mrf.mxu1 }
 0x41e   :  { %v2644_v38 = vpack.c.bf16 %v2194_v59, %v2237_v12  ;;  %v2195_v5 = vmul.f32 2.0, %v2112_v31  ;;  %vm1898_vm14 = vcmp.eq.s32.totalorder %v1855_v48, %v1862_v53 }
 0x41f   :  { %v2114_v19 = vpop.f32.mrf.mxu1 }
 0x420   :  { %2600 = vst.msk [vmem:[%s4627_s3 + $0xf0] sm:$0xff] %vm4121_vm6, %v2644_v38  ;;  %v2239_v32 = vsub.f32 %v2195_v5, %v2545_v27  ;;  %v2196_v58 = vmul.f32 2.0, %v2114_v19  ;;  %v1856_v38 = vadd.s32 144, %v4449_v11 }
 0x421   :  { %v2118_v4 = vpop.f32.mrf.mxu1 }
 0x422   :  { %v2645_v55 = vpack.c.bf16 %v2196_v58, %v2239_v32  ;;  %v2197_v52 = vmul.f32 2.0, %v2118_v4  ;;  %v2553_v32 = vsel %vm1898_vm14, 1.0, %v4808_v10  ;;  %vm1900_vm15 = vcmp.eq.s32.totalorder %v1856_v38, %v1862_v53 }
 0x423   :  { %v2120_v6 = vpop.f32.mrf.mxu1 }
 0x424   :  { %2601 = vst.msk [vmem:[%s4627_s3 + $0xf8] sm:$0xff] %vm4121_vm6, %v2645_v55  ;;  %v2241_v18 = vsub.f32 %v2197_v52, %v2546_v15  ;;  %v2198_v56 = vmul.f32 2.0, %v2120_v6  ;;  %v1857_v55 = vadd.s32 152, %v4449_v11 }
 0x425   :  { %v2122_v24 = vpop.f32.mrf.mxu1 }
 0x426   :  { %v2646_v43 = vpack.c.bf16 %v2198_v56, %v2241_v18  ;;  %v2199_v3 = vmul.f32 2.0, %v2122_v24  ;;  %v2554_v18 = vsel %vm1900_vm15, 1.0, %v4808_v10  ;;  %vm1902_vm0 = vcmp.eq.s32.totalorder %v1857_v55, %v1862_v53 }
 0x427   :  { %v2124_v9 = vpop.f32.mrf.mxu1 }
 0x428   :  { %2602 = vst.msk [vmem:[%s4627_s3 + $0x100] sm:$0xff] %vm4121_vm6, %v2646_v43  ;;  %v2243_v28 = vsub.f32 %v2199_v3, %v2547_v33  ;;  %v2200_v26 = vmul.f32 2.0, %v2124_v9  ;;  %v1858_v43 = vadd.s32 160, %v4449_v11 }
 0x429   :  { %v2128_v7 = vpop.f32.mrf.mxu1 }
 0x42a   :  { %v2647_v50 = vpack.c.bf16 %v2200_v26, %v2243_v28  ;;  %v2201_v22 = vmul.f32 2.0, %v2128_v7  ;;  %v2555_v28 = vsel %vm1902_vm0, 1.0, %v4808_v10  ;;  %vm1904_vm1 = vcmp.eq.s32.totalorder %v1858_v43, %v1862_v53 }
 0x42b   :  { %v2130_v30 = vpop.f32.mrf.mxu1 }
 0x42c   :  { %2603 = vst.msk [vmem:[%s4627_s3 + $0x108] sm:$0xff] %vm4121_vm6, %v2647_v50  ;;  %v2245_v41 = vsub.f32 %v2201_v22, %v2548_v8  ;;  %v2202_v21 = vmul.f32 2.0, %v2130_v30  ;;  %v1859_v50 = vadd.s32 168, %v4449_v11 }
 0x42d   :  { %v2132_v13 = vpop.f32.mrf.mxu1 }
 0x42e   :  { %v2648_v39 = vpack.c.bf16 %v2202_v21, %v2245_v41  ;;  %v2203_v54 = vmul.f32 2.0, %v2132_v13  ;;  %v2556_v41 = vsel %vm1904_vm1, 1.0, %v4808_v10  ;;  %vm1906_vm2 = vcmp.eq.s32.totalorder %v1859_v50, %v1862_v53 }
 0x42f   :  { %v2134_v49 = vpop.f32.mrf.mxu1  ;;  %v2557_v2 = vsel %vm1906_vm2, 1.0, %v4808_v10 }
 0x430   :  { %2604 = vst.msk [vmem:[%s4627_s3 + $0x110] sm:$0xff] %vm4121_vm6, %v2648_v39  ;;  %v2247_v63 = vsub.f32 %v2203_v54, %v2549_v44  ;;  %v2204_v37 = vmul.f32 2.0, %v2134_v49 }
 0x431   :  { %v2138_v0 = vpop.f32.mrf.mxu1 }
 0x432   :  { %v2649_v25 = vpack.c.bf16 %v2204_v37, %v2247_v63  ;;  %v2205_v40 = vmul.f32 2.0, %v2138_v0 }
 0x433   :  { %v2140_v14 = vpop.f32.mrf.mxu1 }
 0x434   :  { %2605 = vst.msk [vmem:[%s4627_s3 + $0x118] sm:$0xff] %vm4121_vm6, %v2649_v25  ;;  %v2249_v61 = vsub.f32 %v2205_v40, %v2550_v17  ;;  %v2206_v51 = vmul.f32 2.0, %v2140_v14 }
 0x435   :  { %v2142_v23 = vpop.f32.mrf.mxu1 }
 0x436   :  { %v2650_v57 = vpack.c.bf16 %v2206_v51, %v2249_v61  ;;  %v2207_v46 = vmul.f32 2.0, %v2142_v23 }
 0x437   :  { %v2144_v34 = vpop.f32.mrf.mxu1 }
 0x438   :  { %2606 = vst.msk [vmem:[%s4627_s3 + $0x120] sm:$0xff] %vm4121_vm6, %v2650_v57  ;;  %v2251_v45 = vsub.f32 %v2207_v46, %v2551_v16  ;;  %v2208_v36 = vmul.f32 2.0, %v2144_v34 }
 0x439   :  { %v2148_v12 = vpop.f32.mrf.mxu1 }
 0x43a   :  { %v2651_v59 = vpack.c.bf16 %v2208_v36, %v2251_v45  ;;  %v2209_v20 = vmul.f32 2.0, %v2148_v12 }
 0x43b   :  { %v2150_v27 = vpop.f32.mrf.mxu1 }
 0x43c   :  { %2607 = vst.msk [vmem:[%s4627_s3 + $0x128] sm:$0xff] %vm4121_vm6, %v2651_v59  ;;  %v2210_v31 = vmul.f32 2.0, %v2150_v27 }
 0x43d   :  { %v2152_v5 = vpop.f32.mrf.mxu1 }
 0x43e   :  { %v2254_v19 = vsub.f32 %v2210_v31, %v2552_v42  ;;  %v2211_v29 = vmul.f32 2.0, %v2152_v5 }
 0x43f   :  { %v2154_v58 = vpop.f32.mrf.mxu1 }
 0x440   :  { %v2652_v15 = vpack.c.bf16 %v2254_v19, %v2209_v20  ;;  %v2212_v4 = vmul.f32 2.0, %v2154_v58 }
 0x441   :  { %v2158_v52 = vpop.f32.mrf.mxu1 }
 0x442   :  { %2608 = vst.msk [vmem:[%s4627_s3 + $0x130] sm:$0xff] %vm4121_vm6, %v2652_v15  ;;  %v2256_v6 = vsub.f32 %v2212_v4, %v2553_v32  ;;  %v2213_v35 = vmul.f32 2.0, %v2158_v52 }
 0x443   :  { %v2160_v56 = vpop.f32.mrf.mxu1 }
 0x444   :  { %v2653_v33 = vpack.c.bf16 %v2256_v6, %v2211_v29  ;;  %v2214_v24 = vmul.f32 2.0, %v2160_v56 }
 0x445   :  { %v2162_v3 = vpop.f32.mrf.mxu1 }
 0x446   :  { %2609 = vst.msk [vmem:[%s4627_s3 + $0x138] sm:$0xff] %vm4121_vm6, %v2653_v33  ;;  %v2258_v9 = vsub.f32 %v2214_v24, %v2554_v18  ;;  %v2215_v60 = vmul.f32 2.0, %v2162_v3 }
 0x447   :  { %v2164_v26 = vpop.f32.mrf.mxu1 }
 0x448   :  { %v2654_v8 = vpack.c.bf16 %v2258_v9, %v2213_v35  ;;  %v2216_v7 = vmul.f32 2.0, %v2164_v26 }
 0x449   :  { %v2168_v22 = vpop.f32.mrf.mxu1 }
 0x44a   :  { %2610 = vst.msk [vmem:[%s4627_s3 + $0x140] sm:$0xff] %vm4121_vm6, %v2654_v8  ;;  %v2260_v30 = vsub.f32 %v2216_v7, %v2555_v28  ;;  %v2217_v11 = vmul.f32 2.0, %v2168_v22 }
 0x44b   :  { %v2170_v21 = vpop.f32.mrf.mxu1 }
 0x44c   :  { %v2655_v44 = vpack.c.bf16 %v2260_v30, %v2215_v60  ;;  %v2218_v13 = vmul.f32 2.0, %v2170_v21 }
 0x44d   :  { %v2172_v39 = vpop.f32.mrf.mxu1 }
 0x44e   :  { %2611 = vst.msk [vmem:[%s4627_s3 + $0x148] sm:$0xff] %vm4121_vm6, %v2655_v44  ;;  %v2262_v54 = vsub.f32 %v2218_v13, %v2556_v41  ;;  %v2219_v17 = vmul.f32 2.0, %v2172_v39 }
 0x44f   :  { %v2174_v49 = vpop.f32.mrf.mxu1 }
 0x450   :  { %v2656_v63 = vpack.c.bf16 %v2262_v54, %v2217_v11  ;;  %v2220_v37 = vmul.f32 2.0, %v2174_v49 }
 0x452   :  { %2612 = vst.msk [vmem:[%s4627_s3 + $0x150] sm:$0xff] %vm4121_vm6, %v2656_v63  ;;  %v2264_v0 = vsub.f32 %v2220_v37, %v2557_v2 }
 0x454   :  { %v2657_v25 = vpack.c.bf16 %v2264_v0, %v2219_v17 }
 0x456   :  { %2613 = vst.msk [vmem:[%s4627_s3 + $0x158] sm:$0x11] %vm4373_vm10, %v2657_v25 }
 0x457   :  { %2424 = vsyncpa [#allocation3], 1 }
 0x458   :  { %2425 = vsyncpa [#allocation5], 1 }

</bundles_post_ra>
